<compile_context>
chip_gen: v7x
topology: tpu7x:2x2x1
jax: 0.10.0
libtpu: 0.0.40
codegen_flags: <defaults>
</compile_context>

<pallas_src>
import functools

import jax
import jax.numpy as jnp
from jax.experimental import pallas as pl
from jax.experimental.pallas import tpu as pltpu


def _pa_kernel(x_ref, w_ref, p_ref, o_ref):
    # x_ref: (1, 1, THp*Wp8, Cin)  one padded row-tile (2-row halo included), channels-last
    # w_ref: (9, Cin, Cpad)        3x3 conv taps, tap index t = 3*dy + dx, Cout padded to Cpad
    # p_ref: (4, Cpad) f32         rows: [bn_scale, bn_shift, pa_w, pa_b]
    # o_ref: (1, 1, TH, W, Cpad)   fused output  x0 * sigmoid(pa_conv(relu(bn(x0))))
    TH, W, Cpad = o_ref.shape[2], o_ref.shape[3], o_ref.shape[4]
    Cin = x_ref.shape[3]
    Wp8 = x_ref.shape[2] // (TH + 2)

    xt = x_ref[0, 0]                                   # (THp*Wp8, Cin), row-flattened tile

    # 3x3 conv as 9 full-width MXU matmuls.  One accumulator per dx; the column shift by
    # dx is applied once at the end on the (Cpad=128)-wide accumulators, so the Cin-wide
    # input is only ever sliced along the 8-aligned major row axis (no per-tap relayouts).
    acc = [jnp.zeros((TH * Wp8, Cpad), jnp.float32) for _ in range(3)]
    for dy in range(3):
        tap = xt[dy * Wp8:(dy + TH) * Wp8, :]          # 8-aligned row slice, free view
        for dx in range(3):
            acc[dx] = acc[dx] + jnp.dot(tap, w_ref[3 * dy + dx],
                                        preferred_element_type=jnp.float32)

    a0 = acc[0].reshape(TH, Wp8, Cpad)[:, 0:W, :]
    a1 = acc[1].reshape(TH, Wp8, Cpad)[:, 1:1 + W, :]
    a2 = acc[2].reshape(TH, Wp8, Cpad)[:, 2:2 + W, :]
    x0 = a0 + a1 + a2                                  # (TH, W, Cpad) f32 == conv output

    bn_scale = p_ref[0:1, :].reshape(1, 1, Cpad)
    bn_shift = p_ref[1:2, :].reshape(1, 1, Cpad)
    pa_w = p_ref[2:3, :].reshape(1, 1, Cpad)
    pa_b = p_ref[3:4, :].reshape(1, 1, Cpad)

    # BatchNorm (eval, folded into scale/shift) + ReLU.  Dropout2d is identity in eval.
    # TODO(synk): train-mode Dropout2d (random whole-channel zeroing) not implemented.
    a = jnp.maximum(x0 * bn_scale + bn_shift, 0.0)
    gate = jax.nn.sigmoid(a * pa_w + pa_b)             # depthwise 1x1 conv + sigmoid
    o_ref[...] = (x0 * gate)[None, None].astype(o_ref.dtype)


@functools.partial(jax.jit, static_argnames=("eps", "block_rows"))
def pa_forward(x, conv_w, bn_gamma, bn_beta, bn_mean, bn_var, pa_w, pa_b,
               eps=1e-5, block_rows=16):
    """PA.forward (eval mode).  x: (B, Cin, H, W) NCHW; weights in PyTorch layouts."""
    B, Cin, H, W = x.shape
    Cout = conv_w.shape[0]
    Cpad = ((Cout + 127) // 128) * 128                 # lane-dense MXU-N / output channels
    matmul_dtype = jnp.bfloat16

    # Row-tile size: largest divisor of H that is <= block_rows.
    TH = min(block_rows, H)
    while H % TH:
        TH -= 1
    n_th = H // TH
    THp = TH + 2

    Wp = W + 2
    Wp8 = ((Wp + 7) // 8) * 8                          # sublane-aligned padded width

    # Channels-last + zero pad (1-pixel conv halo + width alignment), bf16 matmul operands.
    x_nhwc = jnp.transpose(x, (0, 2, 3, 1)).astype(matmul_dtype)
    x_pad = jnp.pad(x_nhwc, ((0, 0), (1, 1), (1, 1 + Wp8 - Wp), (0, 0)))
    # Overlapping row tiles (2-row halo baked in) so blocked BlockSpecs can auto-pipeline.
    # TODO(synk): fuse the transpose / pad / halo duplication into the kernel via manual
    # HBM DMA (memory_space=pl.ANY) to remove this wrapper-side copy of the input.
    rows = jnp.arange(n_th)[:, None] * TH + jnp.arange(THp)[None, :]     # (n_th, THp)
    x_tiles = x_pad[:, rows].reshape(B, n_th, THp * Wp8, Cin)

    # (Cout, Cin, 3, 3) -> (9, Cin, Cout) -> pad Cout to Cpad, bf16 for the MXU.
    w_taps = jnp.transpose(conv_w, (2, 3, 1, 0)).reshape(9, Cin, Cout)
    w_taps = jnp.pad(w_taps, ((0, 0), (0, 0), (0, Cpad - Cout))).astype(matmul_dtype)

    # Fold eval-mode BN into per-channel scale/shift; pack with the depthwise-1x1 params.
    bn_scale = bn_gamma / jnp.sqrt(bn_var + eps)
    bn_shift = bn_beta - bn_mean * bn_scale
    params = jnp.stack([bn_scale, bn_shift, pa_w.reshape(Cout), pa_b.reshape(Cout)], 0)
    params = jnp.pad(params, ((0, 0), (0, Cpad - Cout))).astype(jnp.float32)

    out_dtype = x.dtype

    # VMEM budget: double-buffered in/out blocks + resident weights + f32 accumulators
    # and epilogue temporaries + margin, clamped to a range safe on v5e/v6e/v7x.
    in_block = THp * Wp8 * Cin * jnp.dtype(matmul_dtype).itemsize
    out_block = TH * W * Cpad * jnp.dtype(out_dtype).itemsize
    w_bytes = w_taps.size * jnp.dtype(matmul_dtype).itemsize + params.size * 4
    acc_bytes = 3 * TH * Wp8 * Cpad * 4
    tmp_bytes = 4 * TH * W * Cpad * 4
    vmem_bytes = int(min(max(2 * (in_block + out_block) + 2 * w_bytes
                             + acc_bytes + tmp_bytes + (2 << 20), 24 << 20), 48 << 20))

    out_tiles = pl.pallas_call(
        _pa_kernel,
        out_shape=jax.ShapeDtypeStruct((B, n_th, TH, W, Cpad), out_dtype),
        grid_spec=pltpu.PrefetchScalarGridSpec(
            num_scalar_prefetch=0,
            grid=(B, n_th),
            in_specs=[
                pl.BlockSpec((1, 1, THp * Wp8, Cin), lambda b, t: (b, t, 0, 0)),
                pl.BlockSpec((9, Cin, Cpad), lambda b, t: (0, 0, 0)),
                pl.BlockSpec((4, Cpad), lambda b, t: (0, 0)),
            ],
            out_specs=pl.BlockSpec((1, 1, TH, W, Cpad), lambda b, t: (b, t, 0, 0, 0)),
        ),
        compiler_params=pltpu.CompilerParams(
            dimension_semantics=("parallel", "parallel"),
            vmem_limit_bytes=vmem_bytes,
        ),
    )(x_tiles, w_taps, params)

    # (B, n_th, TH, W, Cpad) -> (B, Cout, H, W) to match the PyTorch NCHW convention.
    out = out_tiles[..., :Cout].reshape(B, H, W, Cout)
    return jnp.transpose(out, (0, 3, 1, 2))


def pa_ref(x, conv_w, bn_gamma, bn_beta, bn_mean, bn_var, pa_w, pa_b, eps=1e-5):
    """Pure-JAX reference matching the PyTorch PA module in eval mode."""
    x0 = jax.lax.conv_general_dilated(
        x, conv_w, window_strides=(1, 1), padding=((1, 1), (1, 1)),
        dimension_numbers=("NCHW", "OIHW", "NCHW"),
        precision=jax.lax.Precision.HIGHEST)
    scale = (bn_gamma / jnp.sqrt(bn_var + eps))[None, :, None, None]
    shift = (bn_beta - bn_mean * bn_gamma / jnp.sqrt(bn_var + eps))[None, :, None, None]
    a = jnp.maximum(x0 * scale + shift, 0.0)
    gate = jax.nn.sigmoid(a * pa_w.reshape(1, -1, 1, 1) + pa_b.reshape(1, -1, 1, 1))
    return x0 * gate


if __name__ == "__main__":
    # Small shapes consistent with the module (defaults inchan=512, out_chan=32, scaled down).
    B, Cin, Cout, H, W = 2, 32, 16, 32, 32

    key = jax.random.PRNGKey(0)
    kx, kw, kg, kb, km, kv, kpw, kpb = jax.random.split(key, 8)

    x = jax.random.normal(kx, (B, Cin, H, W), dtype=jnp.float32)
    conv_w = jax.random.uniform(kw, (Cout, Cin, 3, 3), jnp.float32, -1.0, 1.0) / jnp.sqrt(9.0 * Cin)
    bn_gamma = 1.0 + 0.1 * jax.random.normal(kg, (Cout,), jnp.float32)
    bn_beta = 0.1 * jax.random.normal(kb, (Cout,), jnp.float32)
    bn_mean = 0.1 * jax.random.normal(km, (Cout,), jnp.float32)
    bn_var = jax.random.uniform(kv, (Cout,), jnp.float32, 0.5, 1.5)
    pa_w = jax.random.uniform(kpw, (Cout, 1, 1, 1), jnp.float32, -1.0, 1.0)  # depthwise layout
    pa_b = jax.random.uniform(kpb, (Cout,), jnp.float32, -1.0, 1.0)

    out = pa_forward(x, conv_w, bn_gamma, bn_beta, bn_mean, bn_var, pa_w, pa_b,
                     block_rows=8)
    out = jax.block_until_ready(out)

    ref = pa_ref(x, conv_w, bn_gamma, bn_beta, bn_mean, bn_var, pa_w, pa_b)
    assert out.shape == (B, Cout, H, W)
    max_err = jnp.max(jnp.abs(out - ref))
    # bf16 matmul operands vs a Precision.HIGHEST f32 reference -> looser tolerance.
    assert jnp.allclose(out, ref, atol=3e-2, rtol=3e-2), (
        f"mismatch vs reference: max abs err = {max_err}")

    print("KERNEL_OK")
</pallas_src>

<mosaic_0001>
module attributes {stable_mosaic.version = 11 : i64} {
  func.func @_pa_kernel(%arg0: i32, %arg1: i32, %arg2: memref<1x1x400x32xbf16, #tpu.memory_space<vmem>>, %arg3: memref<9x32x128xbf16, #tpu.memory_space<vmem>>, %arg4: memref<4x128xf32, #tpu.memory_space<vmem>>, %arg5: memref<1x1x8x32x128xf32, #tpu.memory_space<vmem>>) attributes {dimension_semantics = [#tpu.dimension_semantics<parallel>, #tpu.dimension_semantics<parallel>], iteration_bounds = array<i64: 2, 4>, scalar_prefetch = 0 : i64, scratch_operands = 0 : i64, tpu.core_type = #tpu.core_type<tc>, window_params = [{transform_indices = @transform_0, window_bounds = array<i64: 1, 1, 400, 32>}, {pipeline_mode = #tpu.pipeline_mode<synchronous>, transform_indices = @transform_1, window_bounds = array<i64: 9, 32, 128>}, {pipeline_mode = #tpu.pipeline_mode<synchronous>, transform_indices = @transform_2, window_bounds = array<i64: 4, 128>}, {transform_indices = @transform_3, window_bounds = array<i64: 1, 1, 8, 32, 128>}]} {
    %c0 = arith.constant 0 : index
    %c0_0 = arith.constant 0 : index
    %c0_1 = arith.constant 0 : index
    %c0_2 = arith.constant 0 : index
    %0 = vector.load %arg2[%c0, %c0_0, %c0_1, %c0_2] : memref<1x1x400x32xbf16, #tpu.memory_space<vmem>>, vector<1x1x400x32xbf16>
    %1 = vector.shape_cast %0 : vector<1x1x400x32xbf16> to vector<400x32xbf16>
    %cst = arith.constant 0.000000e+00 : f32
    %2 = vector.broadcast %cst : f32 to vector<320x128xf32>
    %cst_3 = arith.constant 0.000000e+00 : f32
    %3 = vector.broadcast %cst_3 : f32 to vector<320x128xf32>
    %cst_4 = arith.constant 0.000000e+00 : f32
    %4 = vector.broadcast %cst_4 : f32 to vector<320x128xf32>
    %5 = vector.extract_strided_slice %1 {offsets = [0, 0], sizes = [320, 32], strides = [1, 1]} : vector<400x32xbf16> to vector<320x32xbf16>
    %c0_5 = arith.constant 0 : index
    %c0_6 = arith.constant 0 : index
    %c0_7 = arith.constant 0 : index
    %6 = vector.load %arg3[%c0_5, %c0_6, %c0_7] : memref<9x32x128xbf16, #tpu.memory_space<vmem>>, vector<1x32x128xbf16>
    %7 = vector.shape_cast %6 : vector<1x32x128xbf16> to vector<32x128xbf16>
    %cst_8 = arith.constant dense<0.000000e+00> : vector<320x128xf32>
    %8 = tpu.matmul %5, %7, %cst_8 {dimension_numbers = #tpu.dot_dimension_numbers<[1], [0], [0], [1], [0, 0, 1, 1], [], []>} : vector<320x32xbf16>, vector<32x128xbf16>, vector<320x128xf32> -> vector<320x128xf32>
    %9 = arith.addf %2, %8 : vector<320x128xf32>
    %c1 = arith.constant 1 : index
    %c0_9 = arith.constant 0 : index
    %c0_10 = arith.constant 0 : index
    %10 = vector.load %arg3[%c1, %c0_9, %c0_10] : memref<9x32x128xbf16, #tpu.memory_space<vmem>>, vector<1x32x128xbf16>
    %11 = vector.shape_cast %10 : vector<1x32x128xbf16> to vector<32x128xbf16>
    %cst_11 = arith.constant dense<0.000000e+00> : vector<320x128xf32>
    %12 = tpu.matmul %5, %11, %cst_11 {dimension_numbers = #tpu.dot_dimension_numbers<[1], [0], [0], [1], [0, 0, 1, 1], [], []>} : vector<320x32xbf16>, vector<32x128xbf16>, vector<320x128xf32> -> vector<320x128xf32>
    %13 = arith.addf %3, %12 : vector<320x128xf32>
    %c2 = arith.constant 2 : index
    %c0_12 = arith.constant 0 : index
    %c0_13 = arith.constant 0 : index
    %14 = vector.load %arg3[%c2, %c0_12, %c0_13] : memref<9x32x128xbf16, #tpu.memory_space<vmem>>, vector<1x32x128xbf16>
    %15 = vector.shape_cast %14 : vector<1x32x128xbf16> to vector<32x128xbf16>
    %cst_14 = arith.constant dense<0.000000e+00> : vector<320x128xf32>
    %16 = tpu.matmul %5, %15, %cst_14 {dimension_numbers = #tpu.dot_dimension_numbers<[1], [0], [0], [1], [0, 0, 1, 1], [], []>} : vector<320x32xbf16>, vector<32x128xbf16>, vector<320x128xf32> -> vector<320x128xf32>
    %17 = arith.addf %4, %16 : vector<320x128xf32>
    %18 = vector.extract_strided_slice %1 {offsets = [40, 0], sizes = [320, 32], strides = [1, 1]} : vector<400x32xbf16> to vector<320x32xbf16>
    %c3 = arith.constant 3 : index
    %c0_15 = arith.constant 0 : index
    %c0_16 = arith.constant 0 : index
    %19 = vector.load %arg3[%c3, %c0_15, %c0_16] : memref<9x32x128xbf16, #tpu.memory_space<vmem>>, vector<1x32x128xbf16>
    %20 = vector.shape_cast %19 : vector<1x32x128xbf16> to vector<32x128xbf16>
    %cst_17 = arith.constant dense<0.000000e+00> : vector<320x128xf32>
    %21 = tpu.matmul %18, %20, %cst_17 {dimension_numbers = #tpu.dot_dimension_numbers<[1], [0], [0], [1], [0, 0, 1, 1], [], []>} : vector<320x32xbf16>, vector<32x128xbf16>, vector<320x128xf32> -> vector<320x128xf32>
    %22 = arith.addf %9, %21 : vector<320x128xf32>
    %c4 = arith.constant 4 : index
    %c0_18 = arith.constant 0 : index
    %c0_19 = arith.constant 0 : index
    %23 = vector.load %arg3[%c4, %c0_18, %c0_19] : memref<9x32x128xbf16, #tpu.memory_space<vmem>>, vector<1x32x128xbf16>
    %24 = vector.shape_cast %23 : vector<1x32x128xbf16> to vector<32x128xbf16>
    %cst_20 = arith.constant dense<0.000000e+00> : vector<320x128xf32>
    %25 = tpu.matmul %18, %24, %cst_20 {dimension_numbers = #tpu.dot_dimension_numbers<[1], [0], [0], [1], [0, 0, 1, 1], [], []>} : vector<320x32xbf16>, vector<32x128xbf16>, vector<320x128xf32> -> vector<320x128xf32>
    %26 = arith.addf %13, %25 : vector<320x128xf32>
    %c5 = arith.constant 5 : index
    %c0_21 = arith.constant 0 : index
    %c0_22 = arith.constant 0 : index
    %27 = vector.load %arg3[%c5, %c0_21, %c0_22] : memref<9x32x128xbf16, #tpu.memory_space<vmem>>, vector<1x32x128xbf16>
    %28 = vector.shape_cast %27 : vector<1x32x128xbf16> to vector<32x128xbf16>
    %cst_23 = arith.constant dense<0.000000e+00> : vector<320x128xf32>
    %29 = tpu.matmul %18, %28, %cst_23 {dimension_numbers = #tpu.dot_dimension_numbers<[1], [0], [0], [1], [0, 0, 1, 1], [], []>} : vector<320x32xbf16>, vector<32x128xbf16>, vector<320x128xf32> -> vector<320x128xf32>
    %30 = arith.addf %17, %29 : vector<320x128xf32>
    %31 = vector.extract_strided_slice %1 {offsets = [80, 0], sizes = [320, 32], strides = [1, 1]} : vector<400x32xbf16> to vector<320x32xbf16>
    %c6 = arith.constant 6 : index
    %c0_24 = arith.constant 0 : index
    %c0_25 = arith.constant 0 : index
    %32 = vector.load %arg3[%c6, %c0_24, %c0_25] : memref<9x32x128xbf16, #tpu.memory_space<vmem>>, vector<1x32x128xbf16>
    %33 = vector.shape_cast %32 : vector<1x32x128xbf16> to vector<32x128xbf16>
    %cst_26 = arith.constant dense<0.000000e+00> : vector<320x128xf32>
    %34 = tpu.matmul %31, %33, %cst_26 {dimension_numbers = #tpu.dot_dimension_numbers<[1], [0], [0], [1], [0, 0, 1, 1], [], []>} : vector<320x32xbf16>, vector<32x128xbf16>, vector<320x128xf32> -> vector<320x128xf32>
    %35 = arith.addf %22, %34 : vector<320x128xf32>
    %c7 = arith.constant 7 : index
    %c0_27 = arith.constant 0 : index
    %c0_28 = arith.constant 0 : index
    %36 = vector.load %arg3[%c7, %c0_27, %c0_28] : memref<9x32x128xbf16, #tpu.memory_space<vmem>>, vector<1x32x128xbf16>
    %37 = vector.shape_cast %36 : vector<1x32x128xbf16> to vector<32x128xbf16>
    %cst_29 = arith.constant dense<0.000000e+00> : vector<320x128xf32>
    %38 = tpu.matmul %31, %37, %cst_29 {dimension_numbers = #tpu.dot_dimension_numbers<[1], [0], [0], [1], [0, 0, 1, 1], [], []>} : vector<320x32xbf16>, vector<32x128xbf16>, vector<320x128xf32> -> vector<320x128xf32>
    %39 = arith.addf %26, %38 : vector<320x128xf32>
    %c8 = arith.constant 8 : index
    %c0_30 = arith.constant 0 : index
    %c0_31 = arith.constant 0 : index
    %40 = vector.load %arg3[%c8, %c0_30, %c0_31] : memref<9x32x128xbf16, #tpu.memory_space<vmem>>, vector<1x32x128xbf16>
    %41 = vector.shape_cast %40 : vector<1x32x128xbf16> to vector<32x128xbf16>
    %cst_32 = arith.constant dense<0.000000e+00> : vector<320x128xf32>
    %42 = tpu.matmul %31, %41, %cst_32 {dimension_numbers = #tpu.dot_dimension_numbers<[1], [0], [0], [1], [0, 0, 1, 1], [], []>} : vector<320x32xbf16>, vector<32x128xbf16>, vector<320x128xf32> -> vector<320x128xf32>
    %43 = arith.addf %30, %42 : vector<320x128xf32>
    %44 = vector.shape_cast %35 : vector<320x128xf32> to vector<8x40x128xf32>
    %45 = vector.extract_strided_slice %44 {offsets = [0, 0, 0], sizes = [8, 32, 128], strides = [1, 1, 1]} : vector<8x40x128xf32> to vector<8x32x128xf32>
    %46 = vector.shape_cast %39 : vector<320x128xf32> to vector<8x40x128xf32>
    %47 = vector.extract_strided_slice %46 {offsets = [0, 1, 0], sizes = [8, 32, 128], strides = [1, 1, 1]} : vector<8x40x128xf32> to vector<8x32x128xf32>
    %48 = vector.shape_cast %43 : vector<320x128xf32> to vector<8x40x128xf32>
    %49 = vector.extract_strided_slice %48 {offsets = [0, 2, 0], sizes = [8, 32, 128], strides = [1, 1, 1]} : vector<8x40x128xf32> to vector<8x32x128xf32>
    %50 = arith.addf %45, %47 : vector<8x32x128xf32>
    %51 = arith.addf %50, %49 : vector<8x32x128xf32>
    %c0_33 = arith.constant 0 : index
    %c0_34 = arith.constant 0 : index
    %52 = vector.load %arg4[%c0_33, %c0_34] : memref<4x128xf32, #tpu.memory_space<vmem>>, vector<1x128xf32>
    %53 = vector.shape_cast %52 : vector<1x128xf32> to vector<1x1x128xf32>
    %c1_35 = arith.constant 1 : index
    %c0_36 = arith.constant 0 : index
    %54 = vector.load %arg4[%c1_35, %c0_36] : memref<4x128xf32, #tpu.memory_space<vmem>>, vector<1x128xf32>
    %55 = vector.shape_cast %54 : vector<1x128xf32> to vector<1x1x128xf32>
    %c2_37 = arith.constant 2 : index
    %c0_38 = arith.constant 0 : index
    %56 = vector.load %arg4[%c2_37, %c0_38] : memref<4x128xf32, #tpu.memory_space<vmem>>, vector<1x128xf32>
    %57 = vector.shape_cast %56 : vector<1x128xf32> to vector<1x1x128xf32>
    %c3_39 = arith.constant 3 : index
    %c0_40 = arith.constant 0 : index
    %58 = vector.load %arg4[%c3_39, %c0_40] : memref<4x128xf32, #tpu.memory_space<vmem>>, vector<1x128xf32>
    %59 = vector.shape_cast %58 : vector<1x128xf32> to vector<1x1x128xf32>
    %60 = vector.broadcast %53 : vector<1x1x128xf32> to vector<8x32x128xf32>
    %61 = arith.mulf %51, %60 : vector<8x32x128xf32>
    %62 = vector.broadcast %55 : vector<1x1x128xf32> to vector<8x32x128xf32>
    %63 = arith.addf %61, %62 : vector<8x32x128xf32>
    %cst_41 = arith.constant 0.000000e+00 : f32
    %64 = vector.broadcast %cst_41 : f32 to vector<8x32x128xf32>
    %65 = arith.maximumf %63, %64 : vector<8x32x128xf32>
    %66 = vector.broadcast %57 : vector<1x1x128xf32> to vector<8x32x128xf32>
    %67 = arith.mulf %65, %66 : vector<8x32x128xf32>
    %68 = vector.broadcast %59 : vector<1x1x128xf32> to vector<8x32x128xf32>
    %69 = arith.addf %67, %68 : vector<8x32x128xf32>
    %70 = arith.negf %69 : vector<8x32x128xf32>
    %71 = math.exp %70 : vector<8x32x128xf32>
    %cst_42 = arith.constant 1.000000e+00 : f32
    %72 = vector.broadcast %cst_42 : f32 to vector<8x32x128xf32>
    %73 = arith.addf %72, %71 : vector<8x32x128xf32>
    %74 = arith.divf %72, %73 : vector<8x32x128xf32>
    %75 = arith.mulf %51, %74 : vector<8x32x128xf32>
    %76 = vector.shape_cast %75 : vector<8x32x128xf32> to vector<1x1x8x32x128xf32>
    %c0_43 = arith.constant 0 : index
    %c0_44 = arith.constant 0 : index
    %c0_45 = arith.constant 0 : index
    %c0_46 = arith.constant 0 : index
    %c0_47 = arith.constant 0 : index
    %77 = vector.load %arg5[%c0_43, %c0_44, %c0_45, %c0_46, %c0_47] : memref<1x1x8x32x128xf32, #tpu.memory_space<vmem>>, vector<1x1x8x32x128xf32>
    tpu.vector_store %arg5[%c0_43, %c0_44, %c0_45, %c0_46, %c0_47], %76 {strides = array<i32>} : memref<1x1x8x32x128xf32, #tpu.memory_space<vmem>>, vector<1x1x8x32x128xf32>,
    return
  }
  func.func @transform_0(%arg0: i32, %arg1: i32) -> (i32, i32, i32, i32) {
    %c0_i32 = arith.constant 0 : i32
    %c0_i32_0 = arith.constant 0 : i32
    %c0_i32_1 = arith.constant 0 : i32
    return %arg0, %arg1, %c0_i32, %c0_i32_0 : i32, i32, i32, i32
  }
  func.func @transform_1(%arg0: i32, %arg1: i32) -> (i32, i32, i32) {
    %c0_i32 = arith.constant 0 : i32
    %c0_i32_0 = arith.constant 0 : i32
    %c0_i32_1 = arith.constant 0 : i32
    %c0_i32_2 = arith.constant 0 : i32
    return %c0_i32, %c0_i32_0, %c0_i32_1 : i32, i32, i32
  }
  func.func @transform_2(%arg0: i32, %arg1: i32) -> (i32, i32) {
    %c0_i32 = arith.constant 0 : i32
    %c0_i32_0 = arith.constant 0 : i32
    %c0_i32_1 = arith.constant 0 : i32
    return %c0_i32, %c0_i32_0 : i32, i32
  }
  func.func @transform_3(%arg0: i32, %arg1: i32) -> (i32, i32, i32, i32, i32) {
    %c0_i32 = arith.constant 0 : i32
    %c0_i32_0 = arith.constant 0 : i32
    %c0_i32_1 = arith.constant 0 : i32
    %c0_i32_2 = arith.constant 0 : i32
    return %arg0, %arg1, %c0_i32, %c0_i32_0, %c0_i32_1 : i32, i32, i32, i32, i32
  }
}

</mosaic_0001>

<bundles_post_ra>
// kernel: pa_forward.1
= control target key start
LH: loop header
LB: loop body
LE: loop exit
PB: predicated region body
PF: predicated region fallthrough
CT: control target
= control target key end

     0   :  { %s4794_s12 = smov 0   ;;  %s4796_s13 = smov 0   ;;  %s6303_s0 = inlined_call_operand.vmem [shape: bf16[2,4,400,32], index: 0, kind: input, shape index: {}]   ;;  %s6304_s1 = inlined_call_operand.vmem [shape: bf16[9,32,128], index: 1, kind: input, shape index: {}]   ;;  %s6305_s2 = inlined_call_operand.vmem [shape: f32[4,128], index: 2, kind: input, shape index: {}]   ;;  %s6306_s3 = inlined_call_operand.vmem [shape: f32[2,4,8,32,128], index: 3, kind: output, shape index: {}]  }
   0x1   :  { %s4798_s14 = smov 0   ;;  %s4800_s15 = smov 0  }
   0x2   :  { %s4802_s16 = smov 0  }
   0x3 LB: > { %s22_s17 = sadd.s32 1, %s4764_s14  ;;  %s25_s18 = sadd.s32 1, %s4768_s15  ;;  %s4772_s16 = sphi %s4802_s16, %s13_s16   ;;  %s4768_s15 = sphi %s4800_s15, %s6356_s15   ;;  %s4764_s14 = sphi %s4798_s14, %s6355_s14   ;;  %s4760_s13 = sphi %s4796_s13, %s6354_s13   ;;  %s4756_s12 = sphi %s4794_s12, %s6353_s12  }
   0x4   : > { %p23_p0 = scmp.ge.s32.totalorder %s22_s17, 4  ;;  %p3405_p1 = scmp.ge.s32.totalorder %s4772_s16, 1 }
   0x5   : > { %p157_p2 = scmp.lt.s32.totalorder %s4772_s16, 9 }
   0x6   : > { %s6358_s17 = smov (%p23_p0, %s22_s17), 0  ;;  %s6360_s18 = smov (!%p23_p0, %s25_s18), %s4768_s15 }
   0x7   : > { %p158_p3 = pnand %p3405_p1, %p157_p2  ;;  %p27_p4 = scmp.ge.s32.totalorder %s6360_s18, 2 }
   0x9   : > { %s6362_s18 = smov (%p27_p4, %s6360_s18), 0  ;;  %161 = sbr.rel (%p158_p3) target bundleno = 690 (0x2b2), region = 32 }
  0x10   : > { %v4539_v0 = vld [vmem:[%s6304_s1 + $0x30] sm:$0xff]   ;;  %p189_p5 = scmp.lt.s32.totalorder %s4760_s13, 1  ;;  %v4540_v1 = vld [vmem:[%s6304_s1] sm:$0xff]   ;;  %p191_p6 = scmp.lt.s32.totalorder %s4756_s12, 3  ;;  %v4541_v2 = vld [vmem:[%s6304_s1 + $0x38] sm:$0xff]   ;;  %vm389_vm0 = vcmask 261120  }
  0x11   : > { %3921 = vmatprep.subr.bf16.mxu1 %v4539_v0  ;;  %3965 = vmatprep.subr.bf16.mxu0 %v4540_v1  ;;  %v4542_v3 = vld [vmem:[%s6304_s1 + $0x8] sm:$0xff]   ;;  %v4549_v4 = vld [vmem:[%s6304_s1 + $0x50] sm:$0xff]   ;;  %v4558_v17 = vld [vmem:[%s6304_s1 + $0x58] sm:$0xff]   ;;  %vm2556_vm1 = vcmask 1046528   ;;  %vm2733_vm2 = vcmask 1045504  }
  0x12   : > { %s6364_s13 = smov (!%p189_p5, %s4760_s13), 1  ;;  %3922 = vmatpush3.bf16.msra.mxu1 %v4539_v0  ;;  %s6366_s12 = smov (!%p191_p6, %s4756_s12), 3  ;;  %3966 = vmatpush3.bf16.msra.mxu0 %v4540_v1  ;;  %v4887_v21 = vld [vmem:[%s6304_s1 + $0x20] sm:$0xff]   ;;  %v4587_v58 = vld [vmem:[%s6304_s1 + $0x28] sm:$0xff]  }
  0x13   : > { %3923 = vmatprep.subr.bf16.mxu1 %v4541_v2  ;;  %s4498_s27 = smul.u32 200, %s6364_s13  ;;  %3967 = vmatprep.subr.bf16.mxu0 %v4542_v3  ;;  %v4898_v24 = vld [vmem:[%s6304_s1 + $0x40] sm:$0xff]   ;;  %s3407_s30 = sshll.u32 %s6366_s12, 5 }
  0x14   : > { %s4497_s28 = smul.u32 50, %s6366_s12  ;;  %v5038_v63 = vld [vmem:[%s6304_s1 + $0x60] sm:$0xff]  }
  0x16   : > { %3924 = vmatpush3.bf16.msra.mxu1 %v4541_v2  ;;  %s195_s4 = sadd.s32 %s4498_s27, %s4497_s28  ;;  %3968 = vmatpush3.bf16.msra.mxu0 %v4542_v3 }
  0x17   : > { %s3406_s5 = sshll.u32 %s195_s4, 2  ;;  %4317 = vmatprep.subr.bf16.mxu1 %v4540_v1  ;;  %4097 = vmatprep.subr.bf16.mxu0 %v4549_v4  ;;  %s3408_s4 = sshll.u32 %s6364_s13, 7 }
  0x18   : > { %s4848_s8 = scalar_lea.vmem %s6303_s0, %s3406_s5  ;;  %s5786_s12 = sadd.s32 %s3408_s4, %s3407_s30 }
  0x19   : > { %v212_v5 = vld [vmem:[%s4848_s8 + $0x10] sm:$0xf]  ;;  %v213_v6 = vld [vmem:[%s4848_s8 + $0x14] sm:$0xf]  ;;  %v214_v7 = vld [vmem:[%s4848_s8 + $0x18] sm:$0xf] }
  0x1a   : > { %v215_v8 = vld [vmem:[%s4848_s8 + $0x1c] sm:$0xf]  ;;  %v4854_v9 = vcombine.low %v213_v6, %v214_v7  ;;  %v4857_v10 = vld [vmem:[%s4848_s8] sm:$0xff]   ;;  %v4862_v12 = vcombine.low %v212_v5, %v213_v6  ;;  %v4867_v14 = vld [vmem:[%s4848_s8 + $0x8] sm:$0xff]   ;;  %s3409_s13 = sshll.u32 %s5786_s12, 3 }
  0x1b   : > { %v216_v11 = vld [vmem:[%s4848_s8 + $0x20] sm:$0xf]  ;;  %v217_v15 = vld [vmem:[%s4848_s8 + $0x24] sm:$0xf]  ;;  %3969 = vmatprep.mubr.msk.bf16.mxu0 %vm389_vm0, %v4857_v10  ;;  %v218_v16 = vld [vmem:[%s4848_s8 + $0x28] sm:$0xf]  ;;  %v4900_v25 = vcombine.low %v214_v7, %v215_v8  ;;  %s5827_s7 = scalar_lea.vmem %s6306_s3, %s3409_s13 }
  0x1c   : > { %3925 = vmatprep.mubr.msk.bf16.mxu1 %vm389_vm0, %v4854_v9  ;;  %v4864_v13 = vcombine.low %v215_v8, %v216_v11  ;;  %3970 = vmatmul.mubr.msk.bf16.vlgmr.msra.gmra.mrb[0].mxu0 %vm389_vm0, %v4867_v14  ;;  %v4880_v18 = vcombine.low %v217_v15, %v218_v16  ;;  %v219_v19 = vld [vmem:[%s4848_s8 + $0x2c] sm:$0xf]  ;;  %v220_v20 = vld [vmem:[%s4848_s8 + $0x30] sm:$0xf]  ;;  %v221_v22 = vld [vmem:[%s4848_s8 + $0x34] sm:$0xf]  ;;  %v4906_v28 = vcombine.low %v216_v11, %v217_v15 }
  0x1d   : > { %4098 = vmatpush3.bf16.msra.mxu0 %v4549_v4  ;;  %3973 = vmatprep.mubr.msk.bf16.mxu0 %vm389_vm0, %v4862_v12  ;;  %v222_v23 = vld [vmem:[%s4848_s8 + $0x38] sm:$0xf]  ;;  %v4902_v26 = vcombine.low %v219_v19, %v220_v20  ;;  %v223_v29 = vld [vmem:[%s4848_s8 + $0x3c] sm:$0xf]  ;;  %v224_v30 = vld [vmem:[%s4848_s8 + $0x40] sm:$0xf]  ;;  %v4922_v33 = vcombine.low %v218_v16, %v219_v19  ;;  %v4926_v35 = vcombine.low %v220_v20, %v221_v22 }
  0x1e   : > { %3926 = vmatmul.mubr.msk.bf16.vlgmr.msra.gmra.mrb[0].mxu1 %vm389_vm0, %v4864_v13  ;;  %4099 = vmatprep.subr.bf16.mxu0 %v4558_v17  ;;  %v4904_v27 = vcombine.low %v221_v22, %v222_v23  ;;  %v225_v31 = vld [vmem:[%s4848_s8 + $0x44] sm:$0xf]  ;;  %v226_v32 = vld [vmem:[%s4848_s8 + $0x48] sm:$0xf]  ;;  %v4924_v34 = vcombine.low %v223_v29, %v224_v30  ;;  %v227_v37 = vld [vmem:[%s4848_s8 + $0x4c] sm:$0xf]  ;;  %v4948_v41 = vcombine.low %v222_v23, %v223_v29 }
  0x1f   : > { %4319 = vmatpush3.bf16.msra.mxu1 %v4540_v1  ;;  %3929 = vmatprep.mubr.msk.bf16.mxu1 %vm389_vm0, %v4880_v18  ;;  %v4928_v36 = vcombine.low %v225_v31, %v226_v32  ;;  %v4932_v38 = vld [vmem:[%s4848_s8 + $0x50] sm:$0xf]  ;;  %v4943_v39 = vld [vmem:[%s4848_s8 + $0x54] sm:$0xf]  ;;  %v4946_v40 = vld [vmem:[%s4848_s8 + $0x58] sm:$0xf]  ;;  %v4953_v43 = vcombine.low %v224_v30, %v225_v31  ;;  %v4979_v49 = vcombine.low %v226_v32, %v227_v37 }
  0x20   : > { %4318 = vmatprep.subr.bf16.mxu1 %v4542_v3  ;;  %v4951_v42 = vcombine.low %v227_v37, %v4932_v38  ;;  %v4957_v44 = vcombine.low %v4943_v39, %v4946_v40  ;;  %v4968_v45 = vld [vmem:[%s4848_s8 + $0x5c] sm:$0xf]  ;;  %v4971_v46 = vld [vmem:[%s4848_s8 + $0x60] sm:$0xf]  ;;  %v4974_v47 = vld [vmem:[%s4848_s8 + $0x64] sm:$0xf]  ;;  %v5107_v23 = vcombine.low %v4932_v38, %v4943_v39 }
  0x21   : > { %4100 = vmatpush3.bf16.msra.mxu0 %v4558_v17  ;;  %v4977_v48 = vld [vmem:[%s4848_s8 + $0x68] sm:$0xf]  ;;  %v4983_v50 = vcombine.low %v4968_v45, %v4971_v46  ;;  %v4998_v52 = vld [vmem:[%s4848_s8 + $0x6c] sm:$0xf]  ;;  %v5001_v53 = vld [vmem:[%s4848_s8 + $0x70] sm:$0xf]  ;;  %v5119_v29 = vcombine.low %v4946_v40, %v4968_v45  ;;  %v5123_v30 = vcombine.low %v4971_v46, %v4974_v47 }
  0x22   : > { %4141 = vmatprep.subr.bf16.mxu0 %v4887_v21  ;;  %v4987_v51 = vcombine.low %v4974_v47, %v4977_v48  ;;  %v5004_v54 = vld [vmem:[%s4848_s8 + $0x74] sm:$0xf]  ;;  %v5007_v55 = vld [vmem:[%s4848_s8 + $0x78] sm:$0xf]  ;;  %v5011_v56 = vcombine.low %v4998_v52, %v5001_v53  ;;  %v239_v59 = vld [vmem:[%s4848_s8 + $0x7c] sm:$0xf]  ;;  %v5142_v37 = vcombine.low %v4977_v48, %v4998_v52 }
  0x23   : > { %4320 = vmatpush3.bf16.msra.mxu1 %v4542_v3  ;;  %v5015_v57 = vcombine.low %v5004_v54, %v5007_v55  ;;  %v240_v60 = vld [vmem:[%s4848_s8 + $0x80] sm:$0xf]  ;;  %v241_v61 = vld [vmem:[%s4848_s8 + $0x84] sm:$0xf]  ;;  %v5033_v62 = vld [vmem:[%s4848_s8 + $0x88] sm:$0xf]  ;;  %v5146_v38 = vcombine.low %v5001_v53, %v5004_v54 }
  0x24   : > { %4009 = vmatprep.subr.bf16.mxu1 %v4898_v24  ;;  %3974 = vmatmul.mubr.msk.bf16.gmra.mrb[4].mxu0 %vm389_vm0, %v4900_v25  ;;  %v5040_v0 = vcombine.low %v239_v59, %v240_v60  ;;  %v5043_v1 = vcombine.low %v241_v61, %v5033_v62  ;;  %v243_v2 = vld [vmem:[%s4848_s8 + $0x8c] sm:$0xf]  ;;  %v244_v3 = vld [vmem:[%s4848_s8 + $0x90] sm:$0xf]  ;;  %v245_v4 = vld [vmem:[%s4848_s8 + $0x94] sm:$0xf]  ;;  %v5159_v39 = vcombine.low %v240_v60, %v241_v61 }
  0x25   : > { %3977 = vmatprep.mubr.msk.bf16.mxu0 %vm389_vm0, %v4906_v28  ;;  %v246_v5 = vld [vmem:[%s4848_s8 + $0x98] sm:$0xf]  ;;  %v5058_v6 = vcombine.low %v243_v2, %v244_v3  ;;  %v247_v8 = vld [vmem:[%s4848_s8 + $0x9c] sm:$0xf]  ;;  %v5072_v11 = vld [vmem:[%s4848_s8 + $0xa0] sm:$0xf]  ;;  %v5170_v40 = vcombine.low %v5033_v62, %v243_v2  ;;  %v5172_v45 = vcombine.low %v244_v3, %v245_v4 }
  0x26   : > { %3930 = vmatmul.mubr.msk.bf16.gmra.mrb[4].mxu1 %vm389_vm0, %v4902_v26  ;;  %v5060_v7 = vcombine.low %v245_v4, %v246_v5  ;;  %v5075_v15 = vld [vmem:[%s4848_s8 + $0xa4] sm:$0xf]  ;;  %v5078_v16 = vld [vmem:[%s4848_s8 + $0xa8] sm:$0xf]  ;;  %v5081_v17 = vcombine.low %v247_v8, %v5072_v11  ;;  %v5096_v20 = vld [vmem:[%s4848_s8 + $0xac] sm:$0xf]  ;;  %v5182_v46 = vcombine.low %v246_v5, %v247_v8 }
  0x27   : > { %3933 = vmatprep.mubr.msk.bf16.mxu1 %vm389_vm0, %v4904_v27  ;;  %v5085_v19 = vcombine.low %v5075_v15, %v5078_v16  ;;  %v4588_v31 = vld [vmem:[%s6304_s1 + $0x48] sm:$0xff]   ;;  %v4589_v32 = vld [vmem:[%s6304_s1 + $0x10] sm:$0xff]   ;;  %v4591_v47 = vld [vmem:[%s6304_s1 + $0x18] sm:$0xff]  }
  0x28   : > { %v4592_v48 = vld [vmem:[%s6304_s1 + $0x68] sm:$0xff]  }
  0x2c   : > { %3978 = vmatmul.mubr.msk.bf16.gmra.mrb[8].mxu0 %vm389_vm0, %v4922_v33 }
  0x2d   : > { %3981 = vmatprep.mubr.msk.bf16.mxu0 %vm389_vm0, %v4926_v35 }
  0x2e   : > { %3934 = vmatmul.mubr.msk.bf16.gmra.mrb[8].mxu1 %vm389_vm0, %v4924_v34 }
  0x2f   : > { %3937 = vmatprep.mubr.msk.bf16.mxu1 %vm389_vm0, %v4928_v36 }
  0x34   : > { %3982 = vmatmul.mubr.msk.bf16.gmra.mrb[12].mxu0 %vm389_vm0, %v4948_v41 }
  0x35   : > { %3985 = vmatprep.mubr.msk.bf16.mxu0 %vm389_vm0, %v4953_v43 }
  0x36   : > { %3938 = vmatmul.mubr.msk.bf16.gmra.mrb[12].mxu1 %vm389_vm0, %v4951_v42 }
  0x37   : > { %3941 = vmatprep.mubr.msk.bf16.mxu1 %vm389_vm0, %v4957_v44 }
  0x3c   : > { %3986 = vmatmul.mubr.msk.bf16.gmra.mrb[16].mxu0 %vm389_vm0, %v4979_v49 }
  0x3d   : > { %4101 = vmatprep.mubr.msk.bf16.mxu0 %vm389_vm0, %v4854_v9 }
  0x3e   : > { %3942 = vmatmul.mubr.msk.bf16.gmra.mrb[16].mxu1 %vm389_vm0, %v4983_v50 }
  0x3f   : > { %3945 = vmatprep.mubr.msk.bf16.mxu1 %vm389_vm0, %v4987_v51 }
  0x44   : > { %4102 = vmatmul.mubr.msk.bf16.vlgmr.msra.gmra.mrb[20].mxu0 %vm389_vm0, %v4864_v13 }
  0x45   : > { %4142 = vmatpush3.bf16.msra.mxu0 %v4887_v21  ;;  %4105 = vmatprep.mubr.msk.bf16.mxu0 %vm389_vm0, %v4880_v18  ;;  %v5099_v21 = vld [vmem:[%s4848_s8 + $0xb0] sm:$0xf] }
  0x46   : > { %3946 = vmatmul.mubr.msk.bf16.gmra.mrb[20].mxu1 %vm389_vm0, %v5011_v56  ;;  %4143 = vmatprep.subr.bf16.mxu0 %v4587_v58  ;;  %v5103_v22 = vcombine.low %v5096_v20, %v5099_v21 }
  0x47   : > { %3949 = vmatprep.mubr.msk.bf16.mxu1 %vm389_vm0, %v5015_v57 }
  0x49   : > { %4144 = vmatpush3.bf16.msra.mxu0 %v4587_v58 }
  0x4a   : > { %4185 = vmatprep.subr.bf16.mxu0 %v5038_v63 }
  0x4c   : > { %4106 = vmatmul.mubr.msk.bf16.gmra.mrb[24].mxu0 %vm389_vm0, %v4902_v26 }
  0x4d   : > { %4109 = vmatprep.mubr.msk.bf16.mxu0 %vm389_vm0, %v4904_v27 }
  0x4e   : > { %3950 = vmatmul.mubr.msk.bf16.gmra.mrb[24].mxu1 %vm389_vm0, %v5040_v0 }
  0x4f   : > { %3953 = vmatprep.mubr.msk.bf16.mxu1 %vm389_vm0, %v5043_v1 }
  0x54   : > { %4110 = vmatmul.mubr.msk.bf16.gmra.mrb[28].mxu0 %vm389_vm0, %v4924_v34 }
  0x55   : > { %4113 = vmatprep.mubr.msk.bf16.mxu0 %vm389_vm0, %v4928_v36 }
  0x56   : > { %3954 = vmatmul.mubr.msk.bf16.gmra.mrb[28].mxu1 %vm389_vm0, %v5058_v6 }
  0x57   : > { %3957 = vmatprep.mubr.msk.bf16.mxu1 %vm389_vm0, %v5060_v7 }
  0x5c   : > { %4114 = vmatmul.mubr.msk.bf16.gmra.mrb[32].mxu0 %vm389_vm0, %v4951_v42 }
  0x5d   : > { %4117 = vmatprep.mubr.msk.bf16.mxu0 %vm389_vm0, %v4957_v44 }
  0x5e   : > { %3958 = vmatmul.mubr.msk.bf16.gmra.mrb[32].mxu1 %vm389_vm0, %v5081_v17 }
  0x5f   : > { %3961 = vmatprep.mubr.msk.bf16.mxu1 %vm389_vm0, %v5085_v19 }
  0x64   : > { %4118 = vmatmul.mubr.msk.bf16.gmra.mrb[36].mxu0 %vm389_vm0, %v4983_v50 }
  0x65   : > { %4121 = vmatprep.mubr.msk.bf16.mxu0 %vm389_vm0, %v4987_v51 }
  0x66   : > { %3962 = vmatmul.mubr.msk.bf16.gmra.mrb[36].mxu1 %vm389_vm0, %v5103_v22 }
  0x67   : > { %3989 = vmatprep.mubr.msk.bf16.mxu1 %vm389_vm0, %v5107_v23 }
  0x6c   : > { %4122 = vmatmul.mubr.msk.bf16.gmra.mrb[40].mxu0 %vm389_vm0, %v5011_v56 }
  0x6d   : > { %4125 = vmatprep.mubr.msk.bf16.mxu0 %vm389_vm0, %v5015_v57 }
  0x6e   : > { %3990 = vmatmul.mubr.msk.bf16.vlgmr.msra.gmra.mrb[20].mxu1 %vm389_vm0, %v5119_v29 }
  0x6f   : > { %4010 = vmatpush3.bf16.msra.mxu1 %v4898_v24  ;;  %3993 = vmatprep.mubr.msk.bf16.mxu1 %vm389_vm0, %v5123_v30  ;;  %v5157_v24 = vcombine.low %v5007_v55, %v239_v59 }
  0x70   : > { %4011 = vmatprep.subr.bf16.mxu1 %v4588_v31 }
  0x73   : > { %4012 = vmatpush3.bf16.msra.mxu1 %v4588_v31 }
  0x74   : > { %4053 = vmatprep.subr.bf16.mxu1 %v4589_v32  ;;  %4126 = vmatmul.mubr.msk.bf16.gmra.mrb[44].mxu0 %vm389_vm0, %v5040_v0 }
  0x75   : > { %4129 = vmatprep.mubr.msk.bf16.mxu0 %vm389_vm0, %v5043_v1 }
  0x76   : > { %3994 = vmatmul.mubr.msk.bf16.gmra.mrb[40].mxu1 %vm389_vm0, %v5142_v37 }
  0x77   : > { %3997 = vmatprep.mubr.msk.bf16.mxu1 %vm389_vm0, %v5146_v38 }
  0x7c   : > { %4130 = vmatmul.mubr.msk.bf16.gmra.mrb[48].mxu0 %vm389_vm0, %v5058_v6 }
  0x7d   : > { %4133 = vmatprep.mubr.msk.bf16.mxu0 %vm389_vm0, %v5060_v7 }
  0x7e   : > { %3998 = vmatmul.mubr.msk.bf16.gmra.mrb[44].mxu1 %vm389_vm0, %v5157_v24 }
  0x7f   : > { %4001 = vmatprep.mubr.msk.bf16.mxu1 %vm389_vm0, %v5159_v39 }
  0x84   : > { %4134 = vmatmul.mubr.msk.bf16.gmra.mrb[52].mxu0 %vm389_vm0, %v5081_v17 }
  0x85   : > { %4137 = vmatprep.mubr.msk.bf16.mxu0 %vm389_vm0, %v5085_v19 }
  0x86   : > { %4002 = vmatmul.mubr.msk.bf16.gmra.mrb[48].mxu1 %vm389_vm0, %v5170_v40 }
  0x87   : > { %4005 = vmatprep.mubr.msk.bf16.mxu1 %vm389_vm0, %v5172_v45 }
  0x8c   : > { %4138 = vmatmul.mubr.msk.bf16.gmra.mrb[56].mxu0 %vm389_vm0, %v5103_v22 }
  0x8d   : > { %4145 = vmatprep.mubr.msk.bf16.mxu0 %vm389_vm0, %v4857_v10 }
  0x8e   : > { %4006 = vmatmul.mubr.msk.bf16.gmra.mrb[52].mxu1 %vm389_vm0, %v5182_v46 }
  0x8f   : > { %4013 = vmatprep.mubr.msk.bf16.mxu1 %vm389_vm0, %v4854_v9  ;;  %v4593_v9 = vld [vmem:[%s6304_s1 + $0x70] sm:$0xff]  }
  0x94   : > { %4146 = vmatmul.mubr.msk.bf16.vlgmr.msra.gmra.mrb[20].mxu0 %vm389_vm0, %v4867_v14 }
  0x95   : > { %4186 = vmatpush3.bf16.msra.mxu0 %v5038_v63  ;;  %4149 = vmatprep.mubr.msk.bf16.mxu0 %vm389_vm0, %v4862_v12 }
  0x96   : > { %4014 = vmatmul.mubr.msk.bf16.vlgmr.msra.gmra.mrb[56].mxu1 %vm389_vm0, %v4864_v13  ;;  %v4594_v13 = vld [vmem:[%s6304_s1 + $0x80] sm:$0xff]   ;;  %4187 = vmatprep.subr.bf16.mxu0 %v4592_v48 }
  0x97   : > { %4054 = vmatpush3.bf16.msra.mxu1 %v4589_v32  ;;  %4017 = vmatprep.mubr.msk.bf16.mxu1 %vm389_vm0, %v4880_v18  ;;  %v4595_v18 = vld [vmem:[%s6304_s1 + $0x78] sm:$0xff]  }
  0x98   : > { %4055 = vmatprep.subr.bf16.mxu1 %v4591_v47 }
  0x99   : > { %4188 = vmatpush3.bf16.msra.mxu0 %v4592_v48 }
  0x9a   : > { %4273 = vmatprep.subr.bf16.mxu0 %v4594_v13 }
  0x9b   : > { %4056 = vmatpush3.bf16.msra.mxu1 %v4591_v47 }
  0x9c   : > { %4229 = vmatprep.subr.bf16.mxu1 %v4593_v9  ;;  %4150 = vmatmul.mubr.msk.bf16.gmra.mrb[24].mxu0 %vm389_vm0, %v4900_v25 }
  0x9d   : > { %4153 = vmatprep.mubr.msk.bf16.mxu0 %vm389_vm0, %v4906_v28 }
  0x9e   : > { %4018 = vmatmul.mubr.msk.bf16.gmra.mrb[60].mxu1 %vm389_vm0, %v4902_v26  ;;  %v4596_v26 = vld [vmem:[%s6304_s1 + $0x88] sm:$0xff]  }
  0x9f   : > { %4021 = vmatprep.mubr.msk.bf16.mxu1 %vm389_vm0, %v4904_v27 }
  0xa4   : > { %4154 = vmatmul.mubr.msk.bf16.gmra.mrb[28].mxu0 %vm389_vm0, %v4922_v33 }
  0xa5   : > { %4157 = vmatprep.mubr.msk.bf16.mxu0 %vm389_vm0, %v4926_v35 }
  0xa6   : > { %4022 = vmatmul.mubr.msk.bf16.gmra.mrb[64].mxu1 %vm389_vm0, %v4924_v34 }
  0xa7   : > { %4025 = vmatprep.mubr.msk.bf16.mxu1 %vm389_vm0, %v4928_v36 }
  0xac   : > { %4158 = vmatmul.mubr.msk.bf16.gmra.mrb[32].mxu0 %vm389_vm0, %v4948_v41 }
  0xad   : > { %4161 = vmatprep.mubr.msk.bf16.mxu0 %vm389_vm0, %v4953_v43 }
  0xae   : > { %4026 = vmatmul.mubr.msk.bf16.gmra.mrb[68].mxu1 %vm389_vm0, %v4951_v42 }
  0xaf   : > { %4029 = vmatprep.mubr.msk.bf16.mxu1 %vm389_vm0, %v4957_v44 }
  0xb4   : > { %4162 = vmatmul.mubr.msk.bf16.gmra.mrb[36].mxu0 %vm389_vm0, %v4979_v49 }
  0xb5   : > { %4165 = vmatprep.mubr.msk.bf16.mxu0 %vm389_vm0, %v5107_v23 }
  0xb6   : > { %4030 = vmatmul.mubr.msk.bf16.gmra.mrb[72].mxu1 %vm389_vm0, %v4983_v50 }
  0xb7   : > { %4033 = vmatprep.mubr.msk.bf16.mxu1 %vm389_vm0, %v4987_v51 }
  0xbc   : > { %4166 = vmatmul.mubr.msk.bf16.gmra.mrb[40].mxu0 %vm389_vm0, %v5119_v29 }
  0xbd   : > { %4169 = vmatprep.mubr.msk.bf16.mxu0 %vm389_vm0, %v5123_v30 }
  0xbe   : > { %4034 = vmatmul.mubr.msk.bf16.gmra.mrb[76].mxu1 %vm389_vm0, %v5011_v56 }
  0xbf   : > { %4037 = vmatprep.mubr.msk.bf16.mxu1 %vm389_vm0, %v5015_v57 }
  0xc4   : > { %4170 = vmatmul.mubr.msk.bf16.gmra.mrb[44].mxu0 %vm389_vm0, %v5142_v37 }
  0xc5   : > { %4173 = vmatprep.mubr.msk.bf16.mxu0 %vm389_vm0, %v5146_v38 }
  0xc6   : > { %4038 = vmatmul.mubr.msk.bf16.gmra.mrb[80].mxu1 %vm389_vm0, %v5040_v0 }
  0xc7   : > { %4041 = vmatprep.mubr.msk.bf16.mxu1 %vm389_vm0, %v5043_v1 }
  0xcc   : > { %4174 = vmatmul.mubr.msk.bf16.gmra.mrb[48].mxu0 %vm389_vm0, %v5157_v24 }
  0xcd   : > { %4177 = vmatprep.mubr.msk.bf16.mxu0 %vm389_vm0, %v5159_v39 }
  0xce   : > { %4042 = vmatmul.mubr.msk.bf16.gmra.mrb[84].mxu1 %vm389_vm0, %v5058_v6 }
  0xcf   : > { %4045 = vmatprep.mubr.msk.bf16.mxu1 %vm389_vm0, %v5060_v7 }
  0xd4   : > { %4178 = vmatmul.mubr.msk.bf16.gmra.mrb[52].mxu0 %vm389_vm0, %v5170_v40 }
  0xd5   : > { %4181 = vmatprep.mubr.msk.bf16.mxu0 %vm389_vm0, %v5172_v45 }
  0xd6   : > { %4046 = vmatmul.mubr.msk.bf16.gmra.mrb[88].mxu1 %vm389_vm0, %v5081_v17 }
  0xd7   : > { %4049 = vmatprep.mubr.msk.bf16.mxu1 %vm389_vm0, %v5085_v19 }
  0xdc   : > { %4182 = vmatmul.mubr.msk.bf16.gmra.mrb[56].mxu0 %vm389_vm0, %v5182_v46 }
  0xdd   : > { %4189 = vmatprep.mubr.msk.bf16.mxu0 %vm389_vm0, %v4922_v33 }
  0xde   : > { %4050 = vmatmul.mubr.msk.bf16.gmra.mrb[92].mxu1 %vm389_vm0, %v5103_v22 }
  0xdf   : > { %4057 = vmatprep.mubr.msk.bf16.mxu1 %vm389_vm0, %v4857_v10 }
  0xe4   : > { %4190 = vmatmul.mubr.msk.bf16.vlgmr.msra.gmra.mrb[0].mxu0 %vm389_vm0, %v4926_v35 }
  0xe5   : > { %4274 = vmatpush3.bf16.msra.mxu0 %v4594_v13  ;;  %4193 = vmatprep.mubr.msk.bf16.mxu0 %vm389_vm0, %v4948_v41 }
  0xe6   : > { %4058 = vmatmul.mubr.msk.bf16.vlgmr.msra.gmra.mrb[56].mxu1 %vm389_vm0, %v4867_v14  ;;  %4275 = vmatprep.subr.bf16.mxu0 %v4596_v26 }
  0xe7   : > { %4230 = vmatpush3.bf16.msra.mxu1 %v4593_v9  ;;  %4061 = vmatprep.mubr.msk.bf16.mxu1 %vm389_vm0, %v4862_v12 }
  0xe8   : > { %4231 = vmatprep.subr.bf16.mxu1 %v4595_v18 }
  0xe9   : > { %4276 = vmatpush3.bf16.msra.mxu0 %v4596_v26 }
  0xeb   : > { %4232 = vmatpush3.bf16.msra.mxu1 %v4595_v18 }
  0xec   : > { %4194 = vmatmul.mubr.msk.bf16.gmra.mrb[60].mxu0 %vm389_vm0, %v4953_v43 }
  0xed   : > { %4197 = vmatprep.mubr.msk.bf16.mxu0 %vm389_vm0, %v4979_v49 }
  0xee   : > { %4062 = vmatmul.mubr.msk.bf16.gmra.mrb[60].mxu1 %vm389_vm0, %v4900_v25 }
  0xef   : > { %4065 = vmatprep.mubr.msk.bf16.mxu1 %vm389_vm0, %v4906_v28 }
  0xf1   : > { %v5307_v10 = vpop.f32.mrb[0].mxu1 }
  0xf2   : > { %v5309_v12 = vpop.f32.mrb[1].mxu1 }
  0xf3   : > { %v5311_v14 = vpop.f32.mrb[2].mxu1 }
  0xf4   : > { %v5313_v27 = vpop.f32.mrb[3].mxu1  ;;  %4198 = vmatmul.mubr.msk.bf16.gmra.mrb[64].mxu0 %vm389_vm0, %v5107_v23 }
  0xf5   : > { %4201 = vmatprep.mubr.msk.bf16.mxu0 %vm389_vm0, %v5119_v29 }
  0xf6   : > { %4066 = vmatmul.mubr.msk.bf16.gmra.mrb[64].mxu1 %vm389_vm0, %v4922_v33 }
  0xf7   : > { %4069 = vmatprep.mubr.msk.bf16.mxu1 %vm389_vm0, %v4926_v35  ;;  %v3975_v28 = vpop.f32.mrb[4].mxu0 }
  0xf8   : > { %v787_v42 = vpop.f32.mrb[5].mxu0 }
  0xf9   : > { %v3931_v25 = vpop.f32.mrb[4].mxu1  ;;  %v3976_v50 = vpop.f32.mrb[6].mxu0 }
  0xfa   : > { %v5323_v34 = vadd.f32 %v3975_v28, %v3931_v25  ;;  %v500_v36 = vpop.f32.mrb[5].mxu1  ;;  %v789_v53 = vpop.f32.mrb[7].mxu0 }
  0xfb   : > { %v3932_v44 = vpop.f32.mrb[6].mxu1 }
  0xfc   : > { %v5325_v51 = vadd.f32 %v3976_v50, %v3932_v44  ;;  %v502_v52 = vpop.f32.mrb[7].mxu1  ;;  %4202 = vmatmul.mubr.msk.bf16.gmra.mrb[68].mxu0 %vm389_vm0, %v5123_v30  ;;  %v5381_v44 = vcombine.low %v5072_v11, %v5075_v15  ;;  %v5385_v50 = vcombine.low %v5078_v16, %v5096_v20  ;;  %v5400_v20 = vld [vmem:[%s4848_s8 + $0xb8] sm:$0xff]  }
  0xfd   : > { %v5327_v54 = vadd.f32 %v789_v53, %v502_v52  ;;  %4205 = vmatprep.mubr.msk.bf16.mxu0 %vm389_vm0, %v5142_v37  ;;  %v253_v52 = vld [vmem:[%s4848_s8 + $0xb4] sm:$0xf] }
  0xfe   : > { %4070 = vmatmul.mubr.msk.bf16.gmra.mrb[68].mxu1 %vm389_vm0, %v4948_v41  ;;  %v5397_v53 = vcombine.low %v5099_v21, %v253_v52  ;;  %v5411_v21 = vld [vmem:[%s4848_s8 + $0xc0] sm:$0xff]  }
  0xff   : > { %4073 = vmatprep.mubr.msk.bf16.mxu1 %vm389_vm0, %v4953_v43  ;;  %v3979_v56 = vpop.f32.mrb[8].mxu0 }
 0x100   : > { %v802_v59 = vpop.f32.mrb[9].mxu0 }
 0x101   : > { %v3935_v55 = vpop.f32.mrb[8].mxu1  ;;  %v3980_v62 = vpop.f32.mrb[10].mxu0 }
 0x102   : > { %v5337_v57 = vadd.f32 %v3979_v56, %v3935_v55  ;;  %v515_v58 = vpop.f32.mrb[9].mxu1  ;;  %v805_v1 = vpop.f32.mrb[11].mxu0 }
 0x103   : > { %v5339_v60 = vadd.f32 %v802_v59, %v515_v58  ;;  %v3936_v61 = vpop.f32.mrb[10].mxu1 }
 0x104   : > { %v5341_v63 = vadd.f32 %v3980_v62, %v3936_v61  ;;  %v518_v0 = vpop.f32.mrb[11].mxu1  ;;  %4206 = vmatmul.mubr.msk.bf16.gmra.mrb[72].mxu0 %vm389_vm0, %v5146_v38 }
 0x105   : > { %4209 = vmatprep.mubr.msk.bf16.mxu0 %vm389_vm0, %v5157_v24 }
 0x106   : > { %4074 = vmatmul.mubr.msk.bf16.gmra.mrb[72].mxu1 %vm389_vm0, %v4979_v49 }
 0x107   : > { %4077 = vmatprep.mubr.msk.bf16.mxu1 %vm389_vm0, %v5107_v23  ;;  %v3983_v3 = vpop.f32.mrb[12].mxu0 }
 0x108   : > { %v817_v5 = vpop.f32.mrb[13].mxu0 }
 0x109   : > { %v3939_v2 = vpop.f32.mrb[12].mxu1  ;;  %v3984_v8 = vpop.f32.mrb[14].mxu0 }
 0x10a   : > { %v530_v4 = vpop.f32.mrb[13].mxu1  ;;  %v820_v22 = vpop.f32.mrb[15].mxu0 }
 0x10b   : > { %v5351_v6 = vadd.f32 %v817_v5, %v530_v4  ;;  %v3940_v7 = vpop.f32.mrb[14].mxu1 }
 0x10c   : > { %v5353_v17 = vadd.f32 %v3984_v8, %v3940_v7  ;;  %v533_v19 = vpop.f32.mrb[15].mxu1  ;;  %4210 = vmatmul.mubr.msk.bf16.gmra.mrb[76].mxu0 %vm389_vm0, %v5159_v39 }
 0x10d   : > { %v5355_v31 = vadd.f32 %v820_v22, %v533_v19  ;;  %4213 = vmatprep.mubr.msk.bf16.mxu0 %vm389_vm0, %v5170_v40 }
 0x10e   : > { %4078 = vmatmul.mubr.msk.bf16.gmra.mrb[76].mxu1 %vm389_vm0, %v5119_v29 }
 0x10f   : > { %4081 = vmatprep.mubr.msk.bf16.mxu1 %vm389_vm0, %v5123_v30  ;;  %v3987_v47 = vpop.f32.mrb[16].mxu0 }
 0x110   : > { %v832_v13 = vpop.f32.mrb[17].mxu0 }
 0x111   : > { %v3943_v32 = vpop.f32.mrb[16].mxu1  ;;  %v3988_v25 = vpop.f32.mrb[18].mxu0 }
 0x112   : > { %v5365_v48 = vadd.f32 %v3987_v47, %v3943_v32  ;;  %v545_v9 = vpop.f32.mrb[17].mxu1  ;;  %v835_v36 = vpop.f32.mrb[19].mxu0 }
 0x113   : > { %v5367_v18 = vadd.f32 %v832_v13, %v545_v9  ;;  %v3944_v26 = vpop.f32.mrb[18].mxu1 }
 0x114   : > { %v548_v28 = vpop.f32.mrb[19].mxu1  ;;  %4214 = vmatmul.mubr.msk.bf16.gmra.mrb[80].mxu0 %vm389_vm0, %v5172_v45 }
 0x115   : > { %v5369_v42 = vadd.f32 %v835_v36, %v548_v28  ;;  %4217 = vmatprep.mubr.msk.bf16.mxu0 %vm389_vm0, %v5182_v46 }
 0x116   : > { %4082 = vmatmul.mubr.msk.bf16.gmra.mrb[80].mxu1 %vm389_vm0, %v5142_v37 }
 0x117   : > { %4085 = vmatprep.mubr.msk.bf16.mxu1 %vm389_vm0, %v5146_v38 }
 0x11c   : > { %4218 = vmatmul.mubr.msk.bf16.gmra.mrb[84].mxu0 %vm389_vm0, %v5381_v44 }
 0x11d   : > { %4221 = vmatprep.mubr.msk.bf16.mxu0 %vm389_vm0, %v5385_v50 }
 0x11e   : > { %4086 = vmatmul.mubr.msk.bf16.gmra.mrb[84].mxu1 %vm389_vm0, %v5157_v24 }
 0x11f   : > { %4089 = vmatprep.mubr.msk.bf16.mxu1 %vm389_vm0, %v5159_v39 }
 0x121   : > { %v3951_v11 = vpop.f32.mrb[24].mxu1 }
 0x122   : > { %v576_v15 = vpop.f32.mrb[25].mxu1 }
 0x123   : > { %v3952_v16 = vpop.f32.mrb[26].mxu1 }
 0x124   : > { %v578_v55 = vpop.f32.mrb[27].mxu1  ;;  %4222 = vmatmul.mubr.msk.bf16.gmra.mrb[88].mxu0 %vm389_vm0, %v5397_v53 }
 0x125   : > { %4225 = vmatprep.mubr.msk.bf16.mxu0 %vm389_vm0, %v5400_v20 }
 0x126   : > { %4090 = vmatmul.mubr.msk.bf16.gmra.mrb[88].mxu1 %vm389_vm0, %v5170_v40 }
 0x127   : > { %4093 = vmatprep.mubr.msk.bf16.mxu1 %vm389_vm0, %v5172_v45 }
 0x129   : > { %v3955_v56 = vpop.f32.mrb[28].mxu1 }
 0x12a   : > { %v591_v58 = vpop.f32.mrb[29].mxu1 }
 0x12b   : > { %v3956_v59 = vpop.f32.mrb[30].mxu1 }
 0x12c   : > { %v594_v61 = vpop.f32.mrb[31].mxu1  ;;  %4226 = vmatmul.mubr.msk.bf16.gmra.mrb[92].mxu0 %vm389_vm0, %v5411_v21 }
 0x12d   : > { %4277 = vmatprep.mubr.msk.bf16.mxu0 %vm389_vm0, %v4922_v33 }
 0x12e   : > { %4094 = vmatmul.mubr.msk.bf16.gmra.mrb[92].mxu1 %vm389_vm0, %v5182_v46 }
 0x12f   : > { %4233 = vmatprep.mubr.msk.bf16.mxu1 %vm389_vm0, %v4922_v33 }
 0x131   : > { %v3959_v62 = vpop.f32.mrb[32].mxu1 }
 0x132   : > { %v606_v0 = vpop.f32.mrb[33].mxu1 }
 0x133   : > { %v3960_v1 = vpop.f32.mrb[34].mxu1 }
 0x134   : > { %v609_v2 = vpop.f32.mrb[35].mxu1  ;;  %4278 = vmatmul.mubr.msk.bf16.vlgmr.msra.gmra.mrb[20].mxu0 %vm389_vm0, %v4926_v35 }
 0x135   : > { %4281 = vmatprep.mubr.msk.bf16.mxu0 %vm389_vm0, %v4948_v41 }
 0x136   : > { %4234 = vmatmul.mubr.msk.bf16.vlgmr.msra.gmra.mrb[56].mxu1 %vm389_vm0, %v4926_v35 }
 0x137   : > { %4237 = vmatprep.mubr.msk.bf16.mxu1 %vm389_vm0, %v4948_v41 }
 0x139   : > { %v3963_v3 = vpop.f32.mrb[36].mxu1 }
 0x13a   : > { %v621_v4 = vpop.f32.mrb[37].mxu1 }
 0x13b   : > { %v3964_v5 = vpop.f32.mrb[38].mxu1 }
 0x13c   : > { %v624_v33 = vpop.f32.mrb[39].mxu1  ;;  %4282 = vmatmul.mubr.msk.bf16.gmra.mrb[24].mxu0 %vm389_vm0, %v4953_v43 }
 0x13d   : > { %4285 = vmatprep.mubr.msk.bf16.mxu0 %vm389_vm0, %v4979_v49 }
 0x13e   : > { %4238 = vmatmul.mubr.msk.bf16.gmra.mrb[60].mxu1 %vm389_vm0, %v4953_v43 }
 0x13f   : > { %4241 = vmatprep.mubr.msk.bf16.mxu1 %vm389_vm0, %v4979_v49 }
 0x141   : > { %v5437_v35 = vpop.f32.mrb[20].mxu1 }
 0x142   : > { %v5439_v7 = vpop.f32.mrb[21].mxu1 }
 0x143   : > { %v5441_v41 = vpop.f32.mrb[22].mxu1 }
 0x144   : > { %v5443_v8 = vpop.f32.mrb[23].mxu1  ;;  %4286 = vmatmul.mubr.msk.bf16.gmra.mrb[28].mxu0 %vm389_vm0, %v5107_v23 }
 0x145   : > { %4289 = vmatprep.mubr.msk.bf16.mxu0 %vm389_vm0, %v5119_v29 }
 0x146   : > { %4242 = vmatmul.mubr.msk.bf16.gmra.mrb[64].mxu1 %vm389_vm0, %v5107_v23 }
 0x147   : > { %4245 = vmatprep.mubr.msk.bf16.mxu1 %vm389_vm0, %v5119_v29 }
 0x149   : > { %v3995_v43 = vpop.f32.mrb[40].mxu1 }
 0x14a   : > { %v5453_v49 = vadd.f32 %v3995_v43, %v3951_v11  ;;  %v863_v19 = vpop.f32.mrb[41].mxu1 }
 0x14b   : > { %v3996_v22 = vpop.f32.mrb[42].mxu1 }
 0x14c   : > { %v5455_v32 = vadd.f32 %v3996_v22, %v3952_v16  ;;  %v865_v47 = vpop.f32.mrb[43].mxu1  ;;  %4290 = vmatmul.mubr.msk.bf16.gmra.mrb[32].mxu0 %vm389_vm0, %v5123_v30 }
 0x14d   : > { %v5457_v9 = vadd.f32 %v865_v47, %v578_v55  ;;  %4293 = vmatprep.mubr.msk.bf16.mxu0 %vm389_vm0, %v5142_v37 }
 0x14e   : > { %4246 = vmatmul.mubr.msk.bf16.gmra.mrb[68].mxu1 %vm389_vm0, %v5123_v30 }
 0x14f   : > { %4249 = vmatprep.mubr.msk.bf16.mxu1 %vm389_vm0, %v5142_v37 }
 0x151   : > { %v3999_v23 = vpop.f32.mrb[44].mxu1 }
 0x152   : > { %v5467_v29 = vadd.f32 %v3999_v23, %v3955_v56  ;;  %v878_v13 = vpop.f32.mrb[45].mxu1 }
 0x153   : > { %v5469_v26 = vadd.f32 %v878_v13, %v591_v58  ;;  %v4000_v25 = vpop.f32.mrb[46].mxu1 }
 0x154   : > { %v5471_v28 = vadd.f32 %v4000_v25, %v3956_v59  ;;  %v881_v36 = vpop.f32.mrb[47].mxu1  ;;  %4294 = vmatmul.mubr.msk.bf16.gmra.mrb[36].mxu0 %vm389_vm0, %v5146_v38 }
 0x155   : > { %4297 = vmatprep.mubr.msk.bf16.mxu0 %vm389_vm0, %v5157_v24 }
 0x156   : > { %4250 = vmatmul.mubr.msk.bf16.gmra.mrb[72].mxu1 %vm389_vm0, %v5146_v38 }
 0x157   : > { %4253 = vmatprep.mubr.msk.bf16.mxu1 %vm389_vm0, %v5157_v24 }
 0x159   : > { %v4003_v30 = vpop.f32.mrb[48].mxu1 }
 0x15a   : > { %v893_v37 = vpop.f32.mrb[49].mxu1 }
 0x15b   : > { %v5481_v52 = vadd.f32 %v893_v37, %v606_v0  ;;  %v4004_v11 = vpop.f32.mrb[50].mxu1 }
 0x15c   : > { %v5483_v15 = vadd.f32 %v4004_v11, %v3960_v1  ;;  %v896_v16 = vpop.f32.mrb[51].mxu1  ;;  %4298 = vmatmul.mubr.msk.bf16.gmra.mrb[40].mxu0 %vm389_vm0, %v5159_v39 }
 0x15d   : > { %v5485_v55 = vadd.f32 %v896_v16, %v609_v2  ;;  %4301 = vmatprep.mubr.msk.bf16.mxu0 %vm389_vm0, %v5170_v40 }
 0x15e   : > { %4254 = vmatmul.mubr.msk.bf16.gmra.mrb[76].mxu1 %vm389_vm0, %v5159_v39 }
 0x15f   : > { %4257 = vmatprep.mubr.msk.bf16.mxu1 %vm389_vm0, %v5170_v40 }
 0x161   : > { %v4007_v38 = vpop.f32.mrb[52].mxu1 }
 0x162   : > { %v5495_v24 = vadd.f32 %v4007_v38, %v3963_v3  ;;  %v908_v56 = vpop.f32.mrb[53].mxu1 }
 0x163   : > { %v5497_v58 = vadd.f32 %v908_v56, %v621_v4  ;;  %v4008_v59 = vpop.f32.mrb[54].mxu1 }
 0x164   : > { %v911_v61 = vpop.f32.mrb[55].mxu1  ;;  %4302 = vmatmul.mubr.msk.bf16.gmra.mrb[44].mxu0 %vm389_vm0, %v5172_v45 }
 0x165   : > { %v5499_v62 = vadd.f32 %v911_v61, %v624_v33  ;;  %4305 = vmatprep.mubr.msk.bf16.mxu0 %vm389_vm0, %v5182_v46 }
 0x166   : > { %4258 = vmatmul.mubr.msk.bf16.gmra.mrb[80].mxu1 %vm389_vm0, %v5172_v45 }
 0x167   : > { %4261 = vmatprep.mubr.msk.bf16.mxu1 %vm389_vm0, %v5182_v46 }
 0x16c   : > { %4306 = vmatmul.mubr.msk.bf16.gmra.mrb[48].mxu0 %vm389_vm0, %v5381_v44 }
 0x16d   : > { %4309 = vmatprep.mubr.msk.bf16.mxu0 %vm389_vm0, %v5385_v50 }
 0x16e   : > { %4262 = vmatmul.mubr.msk.bf16.gmra.mrb[84].mxu1 %vm389_vm0, %v5381_v44 }
 0x16f   : > { %4265 = vmatprep.mubr.msk.bf16.mxu1 %vm389_vm0, %v5385_v50 }
 0x174   : > { %4310 = vmatmul.mubr.msk.bf16.gmra.mrb[52].mxu0 %vm389_vm0, %v5397_v53 }
 0x175   : > { %4313 = vmatprep.mubr.msk.bf16.mxu0 %vm389_vm0, %v5400_v20 }
 0x176   : > { %4266 = vmatmul.mubr.msk.bf16.gmra.mrb[88].mxu1 %vm389_vm0, %v5397_v53 }
 0x177   : > { %4269 = vmatprep.mubr.msk.bf16.mxu1 %vm389_vm0, %v5400_v20 }
 0x17c   : > { %4314 = vmatmul.mubr.msk.bf16.gmra.mrb[56].mxu0 %vm389_vm0, %v5411_v21 }
 0x17e   : > { %4270 = vmatmul.mubr.msk.bf16.gmra.mrb[92].mxu1 %vm389_vm0, %v5411_v21 }
 0x1b7   : > { %v4191_v39 = vpop.f32.mrb[0].mxu0 }
 0x1b8   : > { %v5530_v40 = vadd.f32 %v4191_v39, %v5307_v10  ;;  %v1833_v45 = vpop.f32.mrb[1].mxu0 }
 0x1b9   : > { %v5533_v46 = vadd.f32 %v1833_v45, %v5309_v12  ;;  %v4192_v44 = vpop.f32.mrb[2].mxu0 }
 0x1ba   : > { %v5536_v50 = vadd.f32 %v4192_v44, %v5311_v14  ;;  %v1836_v53 = vpop.f32.mrb[3].mxu0 }
 0x1bb   : > { %v5539_v20 = vadd.f32 %v1836_v53, %v5313_v27 }
 0x1bf   : > { %v4195_v0 = vpop.f32.mrb[60].mxu0 }
 0x1c0   : > { %v5542_v1 = vadd.f32 %v4195_v0, %v5323_v34  ;;  %v1849_v21 = vpop.f32.mrb[61].mxu0 }
 0x1c1   : > { %v4196_v2 = vpop.f32.mrb[62].mxu0 }
 0x1c2   : > { %v5545_v10 = vadd.f32 %v4196_v2, %v5325_v51  ;;  %v1851_v3 = vpop.f32.mrb[63].mxu0 }
 0x1c3   : > { %v5548_v12 = vadd.f32 %v1851_v3, %v5327_v54 }
 0x1c7   : > { %v4199_v4 = vpop.f32.mrb[64].mxu0 }
 0x1c8   : > { %v5551_v14 = vadd.f32 %v4199_v4, %v5337_v57  ;;  %v1864_v5 = vpop.f32.mrb[65].mxu0 }
 0x1c9   : > { %v5554_v27 = vadd.f32 %v1864_v5, %v5339_v60  ;;  %v4200_v33 = vpop.f32.mrb[66].mxu0 }
 0x1ca   : > { %v5557_v34 = vadd.f32 %v4200_v33, %v5341_v63  ;;  %v1867_v43 = vpop.f32.mrb[67].mxu0 }
 0x1cf   : > { %v4203_v19 = vpop.f32.mrb[68].mxu0 }
 0x1d0   : > { %v1879_v51 = vpop.f32.mrb[69].mxu0 }
 0x1d1   : > { %v5560_v22 = vadd.f32 %v1879_v51, %v5351_v6  ;;  %v4204_v54 = vpop.f32.mrb[70].mxu0 }
 0x1d2   : > { %v5563_v47 = vadd.f32 %v4204_v54, %v5353_v17  ;;  %v1882_v57 = vpop.f32.mrb[71].mxu0 }
 0x1d3   : > { %v5566_v23 = vadd.f32 %v1882_v57, %v5355_v31 }
 0x1d7   : > { %v4207_v60 = vpop.f32.mrb[72].mxu0 }
 0x1d8   : > { %v5569_v13 = vadd.f32 %v4207_v60, %v5365_v48  ;;  %v1894_v63 = vpop.f32.mrb[73].mxu0 }
 0x1d9   : > { %v5572_v25 = vadd.f32 %v1894_v63, %v5367_v18  ;;  %v4208_v36 = vpop.f32.mrb[74].mxu0 }
 0x1da   : > { %v1897_v30 = vpop.f32.mrb[75].mxu0 }
 0x1db   : > { %v5575_v6 = vadd.f32 %v1897_v30, %v5369_v42 }
 0x1df   : > { %v4211_v37 = vpop.f32.mrb[76].mxu0 }
 0x1e0   : > { %v5578_v17 = vadd.f32 %v4211_v37, %v5437_v35  ;;  %v1909_v11 = vpop.f32.mrb[77].mxu0 }
 0x1e1   : > { %v5581_v31 = vadd.f32 %v1909_v11, %v5439_v7  ;;  %v4212_v16 = vpop.f32.mrb[78].mxu0 }
 0x1e2   : > { %v5584_v48 = vadd.f32 %v4212_v16, %v5441_v41  ;;  %v1912_v38 = vpop.f32.mrb[79].mxu0 }
 0x1e3   : > { %v5587_v18 = vadd.f32 %v1912_v38, %v5443_v8 }
 0x1e7   : > { %v4215_v56 = vpop.f32.mrb[80].mxu0 }
 0x1e8   : > { %v5590_v42 = vadd.f32 %v4215_v56, %v5453_v49  ;;  %v1925_v59 = vpop.f32.mrb[81].mxu0 }
 0x1e9   : > { %v4216_v61 = vpop.f32.mrb[82].mxu0 }
 0x1ea   : > { %v5593_v35 = vadd.f32 %v4216_v61, %v5455_v32  ;;  %v1927_v39 = vpop.f32.mrb[83].mxu0 }
 0x1eb   : > { %v5596_v7 = vadd.f32 %v1927_v39, %v5457_v9 }
 0x1ef   : > { %v4219_v45 = vpop.f32.mrb[84].mxu0 }
 0x1f0   : > { %v5599_v41 = vadd.f32 %v4219_v45, %v5467_v29  ;;  %v1940_v44 = vpop.f32.mrb[85].mxu0 }
 0x1f1   : > { %v5602_v8 = vadd.f32 %v1940_v44, %v5469_v26  ;;  %v4220_v53 = vpop.f32.mrb[86].mxu0 }
 0x1f2   : > { %v5605_v49 = vadd.f32 %v4220_v53, %v5471_v28  ;;  %v1943_v0 = vpop.f32.mrb[87].mxu0  ;;  %v5634_v53 = vld [vmem:[%s6305_s2] ss:$0 sm:$0xff] }
 0x1f4   : > { %6311 = vst [vmem:[#allocation2_spill] sm:$0xff] %v5605_v49 }
 0x1f7   : > { %v4223_v21 = vpop.f32.mrb[88].mxu0 }
 0x1f8   : > { %v1955_v32 = vpop.f32.mrb[89].mxu0 }
 0x1f9   : > { %v5608_v2 = vadd.f32 %v1955_v32, %v5481_v52  ;;  %v4224_v9 = vpop.f32.mrb[90].mxu0 }
 0x1fa   : > { %v5611_v3 = vadd.f32 %v4224_v9, %v5483_v15  ;;  %v1958_v29 = vpop.f32.mrb[91].mxu0 }
 0x1fb   : > { %6312 = vst [vmem:[#allocation3_spill] sm:$0xff] %v5608_v2  ;;  %v5614_v4 = vadd.f32 %v1958_v29, %v5485_v55 }
 0x1fc   : > { %6313 = vst [vmem:[#allocation4_spill] sm:$0xff] %v5611_v3 }
 0x1fd   : > { %6314 = vst [vmem:[#allocation5_spill] sm:$0xff] %v5614_v4 }
 0x1ff   : > { %v4227_v26 = vpop.f32.mrb[92].mxu0 }
 0x200   : > { %v5617_v5 = vadd.f32 %v4227_v26, %v5495_v24  ;;  %v1970_v28 = vpop.f32.mrb[93].mxu0  ;;  %v5644_v26 = vld [vmem:[%s6305_s2 + $0x1] ss:$0 sm:$0xff] }
 0x201   : > { %v5620_v33 = vadd.f32 %v1970_v28, %v5497_v58  ;;  %v4228_v43 = vpop.f32.mrb[94].mxu0 }
 0x202   : > { %6315 = vst [vmem:[#allocation6_spill] sm:$0xff] %v5617_v5  ;;  %v1973_v19 = vpop.f32.mrb[95].mxu0 }
 0x203   : > { %6316 = vst [vmem:[#allocation7_spill] sm:$0xff] %v5620_v33  ;;  %v5623_v52 = vadd.f32 %v1973_v19, %v5499_v62 }
 0x205   : > { %6317 = vst [vmem:[#allocation8_spill] sm:$0xff] %v5623_v52 }
 0x207   : > { %v4279_v15 = vpop.f32.mrb[20].mxu0 }
 0x208   : > { %v2317_v57 = vpop.f32.mrb[21].mxu0  ;;  %v2737_v24 = vrot.slane %v4279_v15, 2 }
 0x209   : > { %v4235_v51 = vpop.f32.mrb[56].mxu1  ;;  %v4280_v55 = vpop.f32.mrb[22].mxu0  ;;  %v2734_v16 = vrot.slane %v2317_v57, 2 }
 0x20a   : > { %v2067_v54 = vpop.f32.mrb[57].mxu1  ;;  %v2560_v63 = vrot.slane %v4235_v51, 1  ;;  %v2739_v30 = vrot.slane %v4280_v55, 2  ;;  %v2320_v58 = vpop.f32.mrb[23].mxu0 }
 0x20b   : > { %v4236_v60 = vpop.f32.mrb[58].mxu1  ;;  %v2557_v11 = vrot.slane %v2067_v54, 1  ;;  %v2735_v56 = vrot.slane %v2320_v58, 2 }
 0x20c   : > { %v2562_v36 = vrot.slane %v4236_v60, 1  ;;  %v2070_v37 = vpop.f32.mrb[59].mxu1  ;;  %v2740_v59 = vsel %vm2733_vm2, %v2737_v24, %v2739_v30 }
 0x20d   : > { %v2558_v38 = vrot.slane %v2070_v37, 1  ;;  %v2736_v44 = vsel %vm2733_vm2, %v2734_v16, %v2735_v56  ;;  %v2738_v32 = vsel %vm2733_vm2, %v2735_v56, %v2737_v24 }
 0x20e   : > { %v2563_v62 = vsel %vm2556_vm1, %v2560_v63, %v2562_v36 }
 0x20f   : > { %v2663_v61 = vadd.f32 %v5530_v40, %v2563_v62  ;;  %v2559_v39 = vsel %vm2556_vm1, %v2557_v11, %v2558_v38  ;;  %v2561_v45 = vsel %vm2556_vm1, %v2558_v38, %v2560_v63  ;;  %v4283_v29 = vpop.f32.mrb[24].mxu0 }
 0x210   : > { %v2661_v0 = vadd.f32 %v5533_v46, %v2559_v39  ;;  %v2662_v21 = vadd.f32 %v5539_v20, %v2561_v45  ;;  %v2333_v46 = vpop.f32.mrb[25].mxu0  ;;  %v2744_v15 = vrot.slane %v4283_v29, 2 }
 0x211   : > { %v5639_v9 = vadd.f32 %v2740_v59, %v2663_v61  ;;  %v4239_v40 = vpop.f32.mrb[60].mxu1  ;;  %v2741_v57 = vrot.slane %v2333_v46, 2  ;;  %v4284_v55 = vpop.f32.mrb[26].mxu0  ;;  %v5662_v61 = vld [vmem:[%s6305_s2 + $0x2] ss:$0 sm:$0xff] }
 0x212   : > { %v5646_v28 = vadd.f32 %v2736_v44, %v2661_v0  ;;  %v5648_v43 = vadd.f32 %v2738_v32, %v2662_v21  ;;  %v2567_v19 = vrot.slane %v4239_v40, 1  ;;  %v2083_v51 = vpop.f32.mrb[61].mxu1  ;;  %v2746_v58 = vrot.slane %v4284_v55, 2  ;;  %v2336_v16 = vpop.f32.mrb[27].mxu0  ;;  %v5674_v40 = vld [vmem:[%s6305_s2 + $0x3] ss:$0 sm:$0xff] }
 0x213   : > { %v2880_v20 = vmul.f32 %v5634_v53, %v5639_v9  ;;  %v2564_v54 = vrot.slane %v2083_v51, 1  ;;  %v4240_v60 = vpop.f32.mrb[62].mxu1  ;;  %v2742_v62 = vsel %vm2733_vm2, %v2739_v30, %v2741_v57 }
 0x214   : > { %v2878_v63 = vmul.f32 %v5634_v53, %v5646_v28  ;;  %v2879_v24 = vmul.f32 %v5634_v53, %v5648_v43  ;;  %v2569_v37 = vrot.slane %v4240_v60, 1  ;;  %v2086_v11 = vpop.f32.mrb[63].mxu1 }
 0x215   : > { %v2916_v38 = vadd.f32 %v5644_v26, %v2880_v20  ;;  %v2565_v56 = vsel %vm2556_vm1, %v2562_v36, %v2564_v54  ;;  %v2566_v59 = vrot.slane %v2086_v11, 1  ;;  %v2747_v36 = vsel %vm2733_vm2, %v2744_v15, %v2746_v58 }
 0x216   : > { %v2914_v39 = vadd.f32 %v5644_v26, %v2878_v63  ;;  %v2915_v45 = vadd.f32 %v5644_v26, %v2879_v24  ;;  %v2664_v44 = vadd.f32 %v5536_v50, %v2565_v56  ;;  %v2570_v0 = vsel %vm2556_vm1, %v2567_v19, %v2569_v37 }
 0x217   : > { %v2948_v21 = vmax.f32 %v2916_v38, 0.0  ;;  %v2666_v32 = vadd.f32 %v2570_v0, %v5542_v1  ;;  %v2568_v30 = vsel %vm2556_vm1, %v2566_v59, %v2567_v19  ;;  %v2743_v1 = vrot.slane %v2336_v16, 2  ;;  %v4287_v60 = vpop.f32.mrb[28].mxu0 }
 0x218   : > { %v2946_v29 = vmax.f32 %v2914_v39, 0.0  ;;  %v2947_v51 = vmax.f32 %v2915_v45, 0.0  ;;  %v5676_v46 = vadd.f32 %v2742_v62, %v2664_v44  ;;  %v2665_v50 = vadd.f32 %v2568_v30, %v5548_v12  ;;  %v2349_v38 = vpop.f32.mrb[29].mxu0 }
 0x219   : > { %v2984_v20 = vmul.f32 %v5662_v61, %v2948_v21  ;;  %v5680_v54 = vadd.f32 %v2747_v36, %v2666_v32  ;;  %v4243_v57 = vpop.f32.mrb[64].mxu1  ;;  %v2745_v62 = vsel %vm2733_vm2, %v2743_v1, %v2744_v15  ;;  %v2752_v16 = vrot.slane %v4287_v60, 2  ;;  %v5692_v39 = vpop.f32.mrb[30].mxu0 }
 0x21a   : > { %v2982_v19 = vmul.f32 %v5662_v61, %v2946_v29  ;;  %v2983_v55 = vmul.f32 %v5662_v61, %v2947_v51  ;;  %v2881_v63 = vmul.f32 %v5634_v53, %v5676_v46  ;;  %v2575_v24 = vrot.slane %v4243_v57, 1  ;;  %v2099_v11 = vpop.f32.mrb[65].mxu1  ;;  %v2352_v36 = vpop.f32.mrb[31].mxu0 }
 0x21b   : > { %v3020_v56 = vadd.f32 %v5674_v40, %v2984_v20  ;;  %v2883_v12 = vmul.f32 %v5634_v53, %v5680_v54  ;;  %v5690_v59 = vpop.f32.mrb[66].mxu1  ;;  %v5697_v21 = vadd.f32 %v2745_v62, %v2665_v50  ;;  %v2571_v51 = vrot.slane %v2099_v11, 1 }
 0x21c   : > { %v3018_v45 = vadd.f32 %v5674_v40, %v2982_v19  ;;  %v3019_v44 = vadd.f32 %v5674_v40, %v2983_v55  ;;  %v2917_v0 = vadd.f32 %v5644_v26, %v2881_v63  ;;  %v2102_v32 = vpop.f32.mrb[67].mxu1  ;;  %v2748_v15 = vrot.slane %v2349_v38, 2 }
 0x21d   : > { %v3691_v30 = vmul.f32 -1.442695, %v3020_v56  ;;  %v2919_v29 = vadd.f32 %v5644_v26, %v2883_v12  ;;  %v2882_v60 = vmul.f32 %v5634_v53, %v5697_v21  ;;  %v2572_v55 = vsel %vm2556_vm1, %v2569_v37, %v2571_v51 }
 0x21e   : > { %v3689_v20 = vmul.f32 -1.442695, %v3018_v45  ;;  %v3690_v1 = vmul.f32 -1.442695, %v3019_v44  ;;  %v2949_v57 = vmax.f32 %v2917_v0, 0.0  ;;  %v2749_v50 = vsel %vm2733_vm2, %v2746_v58, %v2748_v15 }
 0x21f   : > { %4602 = vpow2.f32 %v3691_v30  ;;  %v2951_v19 = vmax.f32 %v2919_v29, 0.0  ;;  %v2918_v56 = vadd.f32 %v5644_v26, %v2882_v60  ;;  %v2667_v11 = vadd.f32 %v2572_v55, %v5545_v10  ;;  %v5712_v44 = vpop.f32.mrb[32].mxu0 }
 0x220   : > { %4604 = vpow2.f32 %v3689_v20  ;;  %v2985_v63 = vmul.f32 %v5662_v61, %v2949_v57  ;;  %v2576_v12 = vrot.slane %v5690_v59, 1  ;;  %v2753_v62 = vrot.slane %v5692_v39, 2  ;;  %v5719_v10 = vpop.f32.mrb[33].mxu0 }
 0x221   : > { %4606 = vpow2.f32 %v3690_v1  ;;  %v2987_v38 = vmul.f32 %v5662_v61, %v2951_v19  ;;  %v5710_v45 = vpop.f32.mrb[68].mxu1  ;;  %v2950_v58 = vmax.f32 %v2918_v56, 0.0  ;;  %v5715_v0 = vadd.f32 %v2749_v50, %v2667_v11  ;;  %v5726_v60 = vpop.f32.mrb[34].mxu0 }
 0x222   : > { %v3021_v37 = vadd.f32 %v5674_v40, %v2985_v63  ;;  %v2573_v30 = vrot.slane %v2102_v32, 1  ;;  %v5717_v29 = vpop.f32.mrb[69].mxu1  ;;  %v2577_v59 = vsel %vm2556_vm1, %v2575_v24, %v2576_v12  ;;  %v2754_v39 = vsel %vm2733_vm2, %v2752_v16, %v2753_v62  ;;  %v5732_v56 = vpop.f32.mrb[35].mxu0 }
 0x223   : > { %v3023_v20 = vadd.f32 %v5674_v40, %v2987_v38  ;;  %v2750_v1 = vrot.slane %v2352_v36, 2  ;;  %v5724_v57 = vpop.f32.mrb[70].mxu1  ;;  %v2986_v55 = vmul.f32 %v5662_v61, %v2950_v58  ;;  %v2884_v32 = vmul.f32 %v5634_v53, %v5715_v0 }
 0x224   : > { %v3692_v19 = vmul.f32 -1.442695, %v3021_v37  ;;  %v2669_v50 = vadd.f32 %v2577_v59, %v5551_v14  ;;  %v2118_v63 = vpop.f32.mrb[71].mxu1  ;;  %v2574_v24 = vsel %vm2556_vm1, %v2571_v51, %v2573_v30  ;;  %v2582_v36 = vrot.slane %v5710_v45, 1 }
 0x225   : > { %v3694_v11 = vmul.f32 -1.442695, %v3023_v20  ;;  %v2751_v16 = vsel %vm2733_vm2, %v2748_v15, %v2750_v1  ;;  %v3022_v38 = vadd.f32 %v5674_v40, %v2986_v55  ;;  %v2920_v37 = vadd.f32 %v5644_v26, %v2884_v32 }
 0x226   : > { %4608 = vpow2.f32 %v3692_v19  ;;  %v5739_v58 = vadd.f32 %v2754_v39, %v2669_v50  ;;  %v2668_v14 = vadd.f32 %v2574_v24, %v5554_v27  ;;  %v2578_v20 = vrot.slane %v5717_v29, 1 }
 0x227   : > { %4610 = vpow2.f32 %v3694_v11  ;;  %v3693_v52 = vmul.f32 -1.442695, %v3022_v38  ;;  %v2952_v51 = vmax.f32 %v2920_v37, 0.0  ;;  %v2755_v45 = vrot.slane %v5719_v10, 2  ;;  %v5754_v32 = vpop.f32.mrb[36].mxu0 }
 0x228   : > { %v2886_v15 = vmul.f32 %v5634_v53, %v5739_v58  ;;  %v5747_v1 = vadd.f32 %v2751_v16, %v2668_v14  ;;  %v2579_v39 = vsel %vm2556_vm1, %v2576_v12, %v2578_v20  ;;  %v5760_v12 = vpop.f32.mrb[37].mxu0 }
 0x229   : > { %v4603_v30 = vpop.eup %4602  ;;  %v5752_v55 = vpop.f32.mrb[72].mxu1  ;;  %4612 = vpow2.f32 %v3693_v52  ;;  %v2988_v11 = vmul.f32 %v5662_v61, %v2952_v51  ;;  %v2670_v14 = vadd.f32 %v2579_v39, %v5557_v34 }
 0x22a   : > { %v4605_v29 = vpop.eup %4604  ;;  %v3148_v50 = vadd.f32 1.0, %v4603_v30  ;;  %v2922_v10 = vadd.f32 %v5644_v26, %v2886_v15  ;;  %v5758_v24 = vpop.f32.mrb[73].mxu1  ;;  %v2885_v37 = vmul.f32 %v5634_v53, %v5747_v1  ;;  %v2756_v30 = vsel %vm2733_vm2, %v2753_v62, %v2755_v45 }
 0x22b   : > { %v4607_v16 = vpop.eup %4606  ;;  %v3146_v38 = vadd.f32 1.0, %v4605_v29  ;;  %v5766_v52 = vpop.f32.mrb[74].mxu1  ;;  %v3024_v27 = vadd.f32 %v5674_v40, %v2988_v11  ;;  %v5778_v39 = vadd.f32 %v2756_v30, %v2670_v14  ;;  %v2580_v62 = vrot.slane %v2118_v63, 1 }
 0x22c   : > { %v5768_v51 = vpop.f32.mrb[38].mxu0  ;;  %4614 = vrcp.f32 %v3148_v50  ;;  %v3147_v15 = vadd.f32 1.0, %v4607_v16  ;;  %v2954_v19 = vmax.f32 %v2922_v10, 0.0  ;;  %v5771_v59 = vpop.f32.mrb[75].mxu1  ;;  %v2921_v34 = vadd.f32 %v5644_v26, %v2885_v37 }
 0x22d   : > { %v5773_v33 = vpop.f32.mrb[39].mxu0  ;;  %4616 = vrcp.f32 %v3146_v38  ;;  %v3695_v29 = vmul.f32 -1.442695, %v3024_v27  ;;  %v2757_v16 = vrot.slane %v5732_v56, 2  ;;  %v2887_v10 = vmul.f32 %v5634_v53, %v5778_v39 }
 0x22e   : > { %4618 = vrcp.f32 %v3147_v15  ;;  %v2990_v50 = vmul.f32 %v5662_v61, %v2954_v19  ;;  %v2953_v11 = vmax.f32 %v2921_v34, 0.0  ;;  %v2581_v5 = vsel %vm2556_vm1, %v2578_v20, %v2580_v62 }
 0x22f   : > { %v2583_v3 = vsel %vm2556_vm1, %v2580_v62, %v2582_v36  ;;  %4620 = vpow2.f32 %v3695_v29  ;;  %v2671_v27 = vadd.f32 %v2581_v5, %v5560_v22  ;;  %v2923_v30 = vadd.f32 %v5644_v26, %v2887_v10  ;;  %v5796_v15 = vpop.f32.mrb[40].mxu0 }
 0x230   : > { %v4609_v38 = vpop.eup %4608  ;;  %v3026_v63 = vadd.f32 %v5674_v40, %v2990_v50  ;;  %v2672_v19 = vadd.f32 %v2583_v3, %v5566_v23  ;;  %v2989_v14 = vmul.f32 %v5662_v61, %v2953_v11  ;;  %v2758_v20 = vsel %vm2733_vm2, %v2755_v45, %v2757_v16  ;;  %v5805_v3 = vpop.f32.mrb[41].mxu0 }
 0x231   : > { %v4611_v56 = vpop.eup %4610  ;;  %v3149_v37 = vadd.f32 1.0, %v4609_v38  ;;  %v5794_v36 = vpop.f32.mrb[76].mxu1  ;;  %v6318_v29 = vrot.slane %v5712_v44, 2  ;;  %v5801_v5 = vadd.f32 %v2758_v20, %v2671_v27  ;;  %v2955_v50 = vmax.f32 %v2923_v30, 0.0 }
 0x232   : > { %v3151_v34 = vadd.f32 1.0, %v4611_v56  ;;  %v3697_v62 = vmul.f32 -1.442695, %v3026_v63  ;;  %v5803_v23 = vpop.f32.mrb[77].mxu1  ;;  %v3025_v45 = vadd.f32 %v5674_v40, %v2989_v14  ;;  %v5813_v38 = vpop.f32.mrb[42].mxu0  ;;  %v2591_v27 = vrot.slane %v5766_v52, 1 }
 0x233   : > { %v2760_v22 = vsel %vm2733_vm2, %v2757_v16, %v6318_v29  ;;  %4622 = vrcp.f32 %v3149_v37  ;;  %v5811_v10 = vpop.f32.mrb[78].mxu1  ;;  %v4613_v44 = vpop.eup %4612  ;;  %v2888_v16 = vmul.f32 %v5634_v53, %v5801_v5  ;;  %v2991_v30 = vmul.f32 %v5662_v61, %v2955_v50 }
 0x234   : > { %v5809_v11 = vadd.f32 %v2760_v22, %v2672_v19  ;;  %4624 = vrcp.f32 %v3151_v34  ;;  %v5819_v56 = vpop.f32.mrb[79].mxu1  ;;  %v5821_v37 = vpop.f32.mrb[43].mxu0  ;;  %v3150_v14 = vadd.f32 1.0, %v4613_v44  ;;  %v3696_v19 = vmul.f32 -1.442695, %v3025_v45 }
 0x235   : > { %4626 = vpow2.f32 %v3697_v62  ;;  %v2924_v29 = vadd.f32 %v5644_v26, %v2888_v16  ;;  %v2585_v22 = vrot.slane %v5758_v24, 1  ;;  %v3027_v50 = vadd.f32 %v5674_v40, %v2991_v30 }
 0x236   : > { %v4615_v20 = vpop.eup %4614  ;;  %v2889_v34 = vmul.f32 %v5634_v53, %v5809_v11  ;;  %4628 = vrcp.f32 %v3150_v14  ;;  %v6320_v30 = vrot.slane %v5760_v12, 2  ;;  %v6321_v52 = vrot.slane %v5726_v60, 2 }
 0x237   : > { %v4617_v62 = vpop.eup %4616  ;;  %v3244_v45 = vmul.f32 %v4615_v20, %v5639_v9  ;;  %4630 = vpow2.f32 %v3696_v19  ;;  %v2956_v16 = vmax.f32 %v2924_v29, 0.0  ;;  %v3698_v44 = vmul.f32 -1.442695, %v3027_v50  ;;  %v5851_v19 = vpop.f32.mrb[44].mxu0 }
 0x238   : > { %v4619_v63 = vpop.eup %4618  ;;  %v3242_v4 = vmul.f32 %v4617_v62, %v5646_v28  ;;  %v2925_v2 = vadd.f32 %v5644_v26, %v2889_v34  ;;  %v6319_v9 = vrot.slane %v5724_v57, 1  ;;  %v2763_v20 = vsel %vm2733_vm2, %v6321_v52, %v6320_v30  ;;  %v5861_v60 = vpop.f32.mrb[45].mxu0 }
 0x239   : > { %3276 = vst [vmem:[%s5827_s7 + $0x10] sm:$0xff] %v3244_v45  ;;  %v3243_v24 = vmul.f32 %v4619_v63, %v5648_v43  ;;  %v5849_v28 = vpop.f32.mrb[80].mxu1  ;;  %v4621_v34 = vpop.eup %4620  ;;  %v2992_v43 = vmul.f32 %v5662_v61, %v2956_v16  ;;  %v6322_v57 = vrot.slane %v5752_v55, 1  ;;  %4632 = vpow2.f32 %v3698_v44 }
 0x23a   : > { %v2586_v14 = vsel %vm2556_vm1, %v6319_v9, %v2585_v22  ;;  %3274 = vst [vmem:[%s5827_s7] sm:$0xff] %v3242_v4  ;;  %v2957_v29 = vmax.f32 %v2925_v2, 0.0  ;;  %v5859_v45 = vpop.f32.mrb[81].mxu1  ;;  %v3152_v50 = vadd.f32 1.0, %v4621_v34  ;;  %v2768_v4 = vrot.slane %v5768_v51, 2  ;;  %v5868_v16 = vpop.f32.mrb[46].mxu0 }
 0x23b   : > { %v2673_v63 = vadd.f32 %v2586_v14, %v5563_v47  ;;  %v2592_v62 = vsel %vm2556_vm1, %v6322_v57, %v2591_v27  ;;  %3275 = vst [vmem:[%s5827_s7 + $0x8] sm:$0xff] %v3243_v24  ;;  %v5866_v2 = vpop.f32.mrb[82].mxu1  ;;  %v3028_v14 = vadd.f32 %v5674_v40, %v2992_v43  ;;  %v2587_v30 = vrot.slane %v5771_v59, 1  ;;  %v5877_v24 = vpop.f32.mrb[47].mxu0 }
 0x23c   : > { %v2676_v9 = vadd.f32 %v2592_v62, %v5569_v13  ;;  %v2993_v47 = vmul.f32 %v5662_v61, %v2957_v29  ;;  %v5875_v52 = vpop.f32.mrb[83].mxu1  ;;  %4634 = vrcp.f32 %v3152_v50  ;;  %v6323_v51 = vrot.slane %v5754_v32, 2 }
 0x23d   : > { %v5872_v27 = vadd.f32 %v2763_v20, %v2673_v63  ;;  %v4623_v13 = vpop.eup %4622  ;;  %v2764_v34 = vrot.slane %v5773_v33, 2  ;;  %v3699_v63 = vmul.f32 -1.442695, %v3028_v14  ;;  %v6324_v33 = vrot.slane %v5752_v55, 1 }
 0x23e   : > { %v2769_v44 = vsel %vm2733_vm2, %v6323_v51, %v2768_v4  ;;  %v4625_v43 = vpop.eup %4624  ;;  %v3245_v20 = vmul.f32 %v4623_v13, %v5676_v46  ;;  %v3029_v59 = vadd.f32 %v5674_v40, %v2993_v47  ;;  %v2588_v4 = vsel %vm2556_vm1, %v2585_v22, %v2587_v30 }
 0x23f   : > { %v2890_v57 = vmul.f32 %v5634_v53, %v5872_v27  ;;  %v4627_v62 = vpop.eup %4626  ;;  %v3247_v50 = vmul.f32 %v4625_v43, %v5680_v54  ;;  %v5889_v49 = vadd.f32 %v2769_v44, %v2676_v9  ;;  %v2590_v51 = vsel %vm2556_vm1, %v2587_v30, %v6324_v33  ;;  %v5907_v44 = vpop.f32.mrb[48].mxu0 }
 0x240   : > { %3277 = vst [vmem:[%s5827_s7 + $0x18] sm:$0xff] %v3245_v20  ;;  %v3154_v29 = vadd.f32 1.0, %v4627_v62  ;;  %4636 = vpow2.f32 %v3699_v63  ;;  %v3700_v46 = vmul.f32 -1.442695, %v3029_v59  ;;  %v4629_v14 = vpop.eup %4628  ;;  %v2674_v54 = vadd.f32 %v2588_v4, %v5572_v25 }
 0x241   : > { %v2926_v47 = vadd.f32 %v5644_v26, %v2890_v57  ;;  %3279 = vst [vmem:[%s5827_s7 + $0x28] sm:$0xff] %v3247_v50  ;;  %v2893_v13 = vmul.f32 %v5634_v53, %v5889_v49  ;;  %v2675_v9 = vadd.f32 %v2590_v51, %v5575_v6  ;;  %v6325_v22 = vrot.slane %v5760_v12, 2  ;;  %v5905_v30 = vpop.f32.mrb[84].mxu1  ;;  %v4631_v43 = vpop.eup %4630 }
 0x242   : > { %v3246_v20 = vmul.f32 %v4629_v14, %v5697_v21  ;;  %4638 = vrcp.f32 %v3154_v29  ;;  %v6326_v63 = vrot.slane %v5754_v32, 2  ;;  %v5913_v57 = vpop.f32.mrb[85].mxu1  ;;  %v5915_v6 = vpop.f32.mrb[49].mxu0  ;;  %v3153_v12 = vadd.f32 1.0, %v4631_v43 }
 0x243   : > { %v2765_v55 = vsel %vm2733_vm2, %v6325_v22, %v2764_v34  ;;  %v2958_v59 = vmax.f32 %v2926_v47, 0.0  ;;  %4640 = vpow2.f32 %v3700_v46  ;;  %v2929_v62 = vadd.f32 %v5644_v26, %v2893_v13  ;;  %v5920_v4 = vpop.f32.mrb[86].mxu1  ;;  %v5922_v33 = vpop.f32.mrb[50].mxu0 }
 0x244   : > { %v2767_v25 = vsel %vm2733_vm2, %v2764_v34, %v6326_v63  ;;  %v5918_v50 = vadd.f32 %v2765_v55, %v2674_v54  ;;  %3278 = vst [vmem:[%s5827_s7 + $0x20] sm:$0xff] %v3246_v20  ;;  %v2593_v29 = vrot.slane %v5803_v23, 1  ;;  %v5930_v51 = vpop.f32.mrb[87].mxu1  ;;  %v5932_v46 = vpop.f32.mrb[51].mxu0  ;;  %4642 = vrcp.f32 %v3153_v12 }
 0x245   : > { %v2994_v21 = vmul.f32 %v5662_v61, %v2958_v59  ;;  %v5926_v32 = vadd.f32 %v2767_v25, %v2675_v9  ;;  %v4633_v47 = vpop.eup %4632  ;;  %v2961_v14 = vmax.f32 %v2929_v62, 0.0  ;;  %v2770_v54 = vrot.slane %v5805_v3, 2 }
 0x246   : > { %v2891_v13 = vmul.f32 %v5634_v53, %v5918_v50  ;;  %v3155_v22 = vadd.f32 1.0, %v4633_v47  ;;  %v6307_v23 = vrot.slane %v5811_v10, 1  ;;  %v4635_v43 = vpop.eup %4634  ;;  %v6309_v63 = vrot.slane %v5813_v38, 2 }
 0x247   : > { %6327 = vst [vmem:[#allocation9_spill] sm:$0xff] %v5926_v32  ;;  %v3030_v9 = vadd.f32 %v5674_v40, %v2994_v21  ;;  %v2892_v55 = vmul.f32 %v5634_v53, %v5926_v32  ;;  %v2997_v20 = vmul.f32 %v5662_v61, %v2961_v14  ;;  %v2594_v25 = vrot.slane %v5819_v56, 1 }
 0x248   : > { %v2927_v59 = vadd.f32 %v5644_v26, %v2891_v13  ;;  %v3248_v3 = vmul.f32 %v4635_v43, %v5715_v0  ;;  %4644 = vrcp.f32 %v3155_v22  ;;  %v6328_v34 = vrot.slane %v5794_v36, 1  ;;  %v5960_v22 = vpop.f32.mrb[52].mxu0 }
 0x249   : > { %v3701_v12 = vmul.f32 -1.442695, %v3030_v9  ;;  %v2928_v62 = vadd.f32 %v5644_v26, %v2892_v55  ;;  %v3033_v21 = vadd.f32 %v5674_v40, %v2997_v20  ;;  %v6329_v13 = vrot.slane %v5796_v15, 2  ;;  %v5958_v0 = vpop.f32.mrb[88].mxu1  ;;  %6331 = vst [vmem:[#allocation11_spill] sm:$0xff] %v5960_v22 }
 0x24a   : > { %v2959_v47 = vmax.f32 %v2927_v59, 0.0  ;;  %v2599_v14 = vsel %vm2556_vm1, %v6328_v34, %v6307_v23  ;;  %6330 = vst [vmem:[#allocation10_spill] sm:$0xff] %v5958_v0  ;;  %v4637_v9 = vpop.eup %4636  ;;  %3280 = vst [vmem:[%s5827_s7 + $0x30] sm:$0xff] %v3248_v3  ;;  %v2595_v20 = vsel %vm2556_vm1, %v2593_v29, %v2594_v25  ;;  %v5965_v59 = vpop.f32.mrb[89].mxu1 }
 0x24b   : > { %v2776_v56 = vsel %vm2733_vm2, %v6329_v13, %v6309_v63  ;;  %4646 = vpow2.f32 %v3701_v12  ;;  %v2960_v55 = vmax.f32 %v2928_v62, 0.0  ;;  %v2679_v43 = vadd.f32 %v5578_v17, %v2599_v14  ;;  %v5967_v34 = vpop.f32.mrb[53].mxu0  ;;  %v5973_v0 = vpop.f32.mrb[90].mxu1 }
 0x24c   : > { %v3156_v23 = vadd.f32 1.0, %v4637_v9  ;;  %v3704_v32 = vmul.f32 -1.442695, %v3033_v21  ;;  %v2995_v13 = vmul.f32 %v5662_v61, %v2959_v47  ;;  %v6332_v63 = vrot.slane %v5794_v36, 1  ;;  %v5975_v3 = vpop.f32.mrb[54].mxu0  ;;  %v4639_v12 = vpop.eup %4638 }
 0x24d   : > { %v2996_v17 = vmul.f32 %v5662_v61, %v2960_v55  ;;  %v5978_v29 = vadd.f32 %v2776_v56, %v2679_v43  ;;  %v2677_v62 = vadd.f32 %v5581_v31, %v2595_v20  ;;  %v5982_v14 = vpop.f32.mrb[91].mxu1  ;;  %v5984_v47 = vpop.f32.mrb[55].mxu0  ;;  %v2771_v9 = vrot.slane %v5821_v37, 2 }
 0x24e   : > { %v2597_v22 = vsel %vm2556_vm1, %v2594_v25, %v6332_v63  ;;  %v4641_v36 = vpop.eup %4640  ;;  %v3250_v63 = vmul.f32 %v4639_v12, %v5739_v58  ;;  %4648 = vrcp.f32 %v3156_v23  ;;  %v3031_v25 = vadd.f32 %v5674_v40, %v2995_v13 }
 0x24f   : > { %v2678_v21 = vadd.f32 %v5587_v18, %v2597_v22  ;;  %v3157_v55 = vadd.f32 1.0, %v4641_v36  ;;  %4650 = vpow2.f32 %v3704_v32  ;;  %v3032_v56 = vadd.f32 %v5674_v40, %v2996_v17  ;;  %v4643_v18 = vpop.eup %4642 }
 0x250   : > { %v2896_v31 = vmul.f32 %v5634_v53, %v5978_v29  ;;  %3282 = vst [vmem:[%s5827_s7 + $0x40] sm:$0xff] %v3250_v63  ;;  %v3702_v22 = vmul.f32 -1.442695, %v3031_v25  ;;  %v2772_v43 = vsel %vm2733_vm2, %v2770_v54, %v2771_v9  ;;  %v6333_v58 = vrot.slane %v5796_v15, 2  ;;  %v6007_v15 = vpop.f32.mrb[56].mxu0 }
 0x251   : > { %v2603_v20 = vrot.slane %v5849_v28, 1  ;;  %v3249_v37 = vmul.f32 %v4643_v18, %v5747_v1  ;;  %4652 = vrcp.f32 %v3157_v55  ;;  %v3703_v32 = vmul.f32 -1.442695, %v3032_v56  ;;  %v6005_v54 = vpop.f32.mrb[92].mxu1 }
 0x252   : > { %v2774_v23 = vsel %vm2733_vm2, %v2771_v9, %v6333_v58  ;;  %v2932_v13 = vadd.f32 %v5644_v26, %v2896_v31  ;;  %4654 = vpow2.f32 %v3702_v22  ;;  %v6000_v12 = vadd.f32 %v2772_v43, %v2677_v62  ;;  %v4645_v63 = vpop.eup %4644  ;;  %v6012_v9 = vpop.f32.mrb[93].mxu1 }
 0x253   : > { %v6002_v17 = vadd.f32 %v2774_v23, %v2678_v21  ;;  %3281 = vst [vmem:[%s5827_s7 + $0x38] sm:$0xff] %v3249_v37  ;;  %4656 = vpow2.f32 %v3703_v32  ;;  %v2600_v1 = vrot.slane %v5859_v45, 1  ;;  %v2777_v25 = vrot.slane %v5861_v60, 2  ;;  %v6014_v62 = vpop.f32.mrb[57].mxu0  ;;  %v6022_v18 = vpop.f32.mrb[94].mxu1 }
 0x254   : > { %v2964_v28 = vmax.f32 %v2932_v13, 0.0  ;;  %v3251_v21 = vmul.f32 %v4645_v63, %v5778_v39  ;;  %v2894_v55 = vmul.f32 %v5634_v53, %v6000_v12  ;;  %v6310_v31 = vrot.slane %v5866_v2, 1  ;;  %v6024_v45 = vpop.f32.mrb[58].mxu0  ;;  %v6034_v32 = vpop.f32.mrb[95].mxu1 }
 0x255   : > { %v2895_v56 = vmul.f32 %v5634_v53, %v6002_v17  ;;  %v4647_v60 = vpop.eup %4646  ;;  %v6334_v43 = vrot.slane %v5811_v10, 1  ;;  %v6335_v39 = vrot.slane %v5813_v38, 2  ;;  %v2782_v37 = vrot.slane %v5868_v16, 2  ;;  %6336 = vst [vmem:[#allocation12_spill] sm:$0xff] %v6034_v32  ;;  %v6036_v13 = vpop.f32.mrb[59].mxu0 }
 0x256   : > { %v3000_v22 = vmul.f32 %v5662_v61, %v2964_v28  ;;  %6337 = vst [vmem:[#allocation13_spill] sm:$0xff] %v6036_v13  ;;  %3283 = vst [vmem:[%s5827_s7 + $0x48] sm:$0xff] %v3251_v21  ;;  %v3158_v63 = vadd.f32 1.0, %v4647_v60  ;;  %v2930_v36 = vadd.f32 %v5644_v26, %v2894_v55  ;;  %v2606_v38 = vsel %vm2556_vm1, %v2603_v20, %v6310_v31 }
 0x257   : > { %v2601_v58 = vsel %vm2556_vm1, %v6334_v43, %v2600_v1  ;;  %v2778_v23 = vsel %vm2733_vm2, %v6335_v39, %v2777_v25  ;;  %v2931_v28 = vadd.f32 %v5644_v26, %v2895_v56  ;;  %v6338_v25 = vrot.slane %v5851_v19, 2 }
 0x258   : > { %v2680_v10 = vadd.f32 %v5584_v48, %v2601_v58  ;;  %v3036_v1 = vadd.f32 %v5674_v40, %v3000_v22  ;;  %v2602_v21 = vrot.slane %v5875_v52, 1  ;;  %v4649_v55 = vpop.eup %4648  ;;  %4658 = vrcp.f32 %v3158_v63 }
 0x259   : > { %v2783_v43 = vsel %vm2733_vm2, %v6338_v25, %v2782_v37  ;;  %v2962_v56 = vmax.f32 %v2930_v36, 0.0  ;;  %v2963_v60 = vmax.f32 %v2931_v28, 0.0  ;;  %v4651_v22 = vpop.eup %4650  ;;  %v3252_v58 = vmul.f32 %v4649_v55, %v5801_v5 }
 0x25a   : > { %v6052_v48 = vadd.f32 %v2778_v23, %v2680_v10  ;;  %v3707_v39 = vmul.f32 -1.442695, %v3036_v1  ;;  %v2682_v31 = vadd.f32 %v2606_v38, %v5590_v42  ;;  %v2604_v13 = vsel %vm2556_vm1, %v2602_v21, %v2603_v20 }
 0x25b   : > { %v3161_v32 = vadd.f32 1.0, %v4651_v22  ;;  %v2998_v25 = vmul.f32 %v5662_v61, %v2962_v56  ;;  %v2999_v52 = vmul.f32 %v5662_v61, %v2963_v60  ;;  %v4653_v36 = vpop.eup %4652  ;;  %3284 = vst [vmem:[%s5827_s7 + $0x50] sm:$0xff] %v3252_v58  ;;  %v2681_v5 = vadd.f32 %v2604_v13, %v5596_v7 }
 0x25c   : > { %v2897_v63 = vmul.f32 %v5634_v53, %v6052_v48  ;;  %4660 = vpow2.f32 %v3707_v39  ;;  %v6062_v23 = vadd.f32 %v2783_v43, %v2682_v31  ;;  %v2779_v42 = vrot.slane %v5877_v24, 2  ;;  %v4655_v28 = vpop.eup %4654 }
 0x25d   : > { %v3253_v20 = vmul.f32 %v4653_v36, %v5809_v11  ;;  %4662 = vrcp.f32 %v3161_v32  ;;  %v3034_v10 = vadd.f32 %v5674_v40, %v2998_v25  ;;  %v3035_v1 = vadd.f32 %v5674_v40, %v2999_v52  ;;  %v4657_v38 = vpop.eup %4656 }
 0x25e   : > { %v3159_v21 = vadd.f32 1.0, %v4655_v28  ;;  %v2933_v55 = vadd.f32 %v5644_v26, %v2897_v63  ;;  %v2899_v31 = vmul.f32 %v5634_v53, %v6062_v23  ;;  %v6339_v43 = vrot.slane %v5851_v19, 2 }
 0x25f   : > { %3285 = vst [vmem:[%s5827_s7 + $0x58] sm:$0xff] %v3253_v20  ;;  %v3160_v24 = vadd.f32 1.0, %v4657_v38  ;;  %v3705_v13 = vmul.f32 -1.442695, %v3034_v10  ;;  %v3706_v11 = vmul.f32 -1.442695, %v3035_v1 }
 0x260   : > { %v2781_v7 = vsel %vm2733_vm2, %v2779_v42, %v6339_v43  ;;  %4664 = vrcp.f32 %v3159_v21  ;;  %v2965_v56 = vmax.f32 %v2933_v55, 0.0  ;;  %v2935_v60 = vadd.f32 %v5644_v26, %v2899_v31 }
 0x261   : > { %v6076_v32 = vadd.f32 %v2781_v7, %v2681_v5  ;;  %v2611_v22 = vrot.slane %v5905_v30, 1  ;;  %4666 = vrcp.f32 %v3160_v24  ;;  %v2788_v19 = vrot.slane %v5907_v44, 2 }
 0x262   : > { %v2607_v39 = vrot.slane %v5913_v57, 1  ;;  %4668 = vpow2.f32 %v3705_v13  ;;  %v3001_v25 = vmul.f32 %v5662_v61, %v2965_v56  ;;  %v2967_v52 = vmax.f32 %v2935_v60, 0.0  ;;  %v4659_v36 = vpop.eup %4658 }
 0x263   : > { %v2898_v58 = vmul.f32 %v5634_v53, %v6076_v32  ;;  %v2784_v63 = vrot.slane %v5915_v6, 2  ;;  %4670 = vpow2.f32 %v3706_v11  ;;  %v6340_v30 = vrot.slane %v5866_v2, 1 }
 0x264   : > { %v2612_v28 = vrot.slane %v5920_v4, 1  ;;  %v3254_v44 = vmul.f32 %v4659_v36, %v5872_v27  ;;  %v3037_v57 = vadd.f32 %v5674_v40, %v3001_v25  ;;  %v3003_v20 = vmul.f32 %v5662_v61, %v2967_v52  ;;  %v6341_v36 = vld [vmem:[#allocation10_spill] sm:$0xff] }
 0x265   : > { %v2934_v5 = vadd.f32 %v5644_v26, %v2898_v58  ;;  %v2608_v42 = vsel %vm2556_vm1, %v6340_v30, %v2607_v39  ;;  %v2785_v6 = vsel %vm2733_vm2, %v2782_v37, %v2784_v63  ;;  %v2789_v2 = vrot.slane %v5922_v33, 2  ;;  %v6342_v30 = vld [vmem:[#allocation9_spill] sm:$0xff] }
 0x266   : > { %v2683_v10 = vadd.f32 %v2608_v42, %v5593_v35  ;;  %v2613_v38 = vsel %vm2556_vm1, %v2611_v22, %v2612_v28  ;;  %v4661_v21 = vpop.eup %4660  ;;  %3286 = vst [vmem:[%s5827_s7 + $0x60] sm:$0xff] %v3254_v44  ;;  %v3708_v4 = vmul.f32 -1.442695, %v3037_v57  ;;  %v3039_v27 = vadd.f32 %v5674_v40, %v3003_v20  ;;  %v6343_v20 = vld [vmem:[#allocation11_spill] sm:$0xff] }
 0x267   : > { %v2966_v1 = vmax.f32 %v2934_v5, 0.0  ;;  %v2685_v31 = vadd.f32 %v2613_v38, %v5599_v41  ;;  %v4663_v35 = vpop.eup %4662  ;;  %v3164_v43 = vadd.f32 1.0, %v4661_v21  ;;  %v2790_v37 = vsel %vm2733_vm2, %v2788_v19, %v2789_v2 }
 0x268   : > { %v6102_v55 = vadd.f32 %v2785_v6, %v2683_v10  ;;  %v2609_v7 = vrot.slane %v5930_v51, 1  ;;  %v3257_v33 = vmul.f32 %v4663_v35, %v5889_v49  ;;  %4672 = vpow2.f32 %v3708_v4 }
 0x269   : > { %v3002_v16 = vmul.f32 %v5662_v61, %v2966_v1  ;;  %v3710_v24 = vmul.f32 -1.442695, %v3039_v27  ;;  %4674 = vrcp.f32 %v3164_v43  ;;  %v6112_v56 = vadd.f32 %v2790_v37, %v2685_v31 }
 0x26a   : > { %v2900_v13 = vmul.f32 %v5634_v53, %v6102_v55  ;;  %v2610_v41 = vsel %vm2556_vm1, %v2607_v39, %v2609_v7  ;;  %v4665_v60 = vpop.eup %4664  ;;  %3289 = vst [vmem:[%s5827_s7 + $0x78] sm:$0xff] %v3257_v33  ;;  %v2786_v22 = vrot.slane %v5932_v46, 2  ;;  %v2618_v39 = vrot.slane %v6341_v36, 1  ;;  %v6344_v7 = vld [vmem:[#allocation2_spill] sm:$0xff]  ;;  %v6346_v36 = vld [vmem:[#allocation5_spill] sm:$0xff] }
 0x26b   : > { %v3038_v11 = vadd.f32 %v5674_v40, %v3002_v16  ;;  %4676 = vpow2.f32 %v3710_v24  ;;  %v2684_v49 = vadd.f32 %v2610_v41, %v5602_v8  ;;  %v4667_v58 = vpop.eup %4666  ;;  %v3255_v19 = vmul.f32 %v4665_v60, %v5918_v50 }
 0x26c   : > { %v2936_v51 = vadd.f32 %v5644_v26, %v2900_v13  ;;  %v2902_v52 = vmul.f32 %v5634_v53, %v6112_v56  ;;  %v4669_v5 = vpop.eup %4668  ;;  %v3256_v42 = vmul.f32 %v4667_v58, %v6342_v30  ;;  %v2787_v57 = vsel %vm2733_vm2, %v2784_v63, %v2786_v22 }
 0x26d   : > { %v3709_v25 = vmul.f32 -1.442695, %v3038_v11  ;;  %v2795_v8 = vrot.slane %v6343_v20, 2  ;;  %v4671_v10 = vpop.eup %4670  ;;  %3287 = vst [vmem:[%s5827_s7 + $0x68] sm:$0xff] %v3255_v19  ;;  %v3162_v46 = vadd.f32 1.0, %v4669_v5  ;;  %v6128_v1 = vadd.f32 %v2787_v57, %v2684_v49 }
 0x26e   : > { %v2968_v44 = vmax.f32 %v2936_v51, 0.0  ;;  %v2938_v50 = vadd.f32 %v5644_v26, %v2902_v52  ;;  %3288 = vst [vmem:[%s5827_s7 + $0x70] sm:$0xff] %v3256_v42  ;;  %v3163_v6 = vadd.f32 1.0, %v4671_v10  ;;  %v2614_v21 = vrot.slane %v5965_v59, 1  ;;  %v6158_v19 = vld [vmem:[%s6305_s2] ss:$0 sm:$0xff] }
 0x26f   : > { %4678 = vpow2.f32 %v3709_v25  ;;  %v2791_v4 = vrot.slane %v5967_v34, 2  ;;  %v2901_v27 = vmul.f32 %v5634_v53, %v6128_v1  ;;  %v2620_v31 = vrot.slane %v5973_v0, 1  ;;  %v6171_v20 = vld [vmem:[%s6305_s2 + $0x1] ss:$0 sm:$0xff] }
 0x270   : > { %v3004_v38 = vmul.f32 %v5662_v61, %v2968_v44  ;;  %4680 = vrcp.f32 %v3162_v46  ;;  %v2970_v63 = vmax.f32 %v2938_v50, 0.0  ;;  %v2615_v43 = vsel %vm2556_vm1, %v2612_v28, %v2614_v21 }
 0x271   : > { %4682 = vrcp.f32 %v3163_v6  ;;  %v2792_v16 = vsel %vm2733_vm2, %v2789_v2, %v2791_v4  ;;  %v2937_v59 = vadd.f32 %v5644_v26, %v2901_v27  ;;  %v2686_v34 = vadd.f32 %v2615_v43, %v6344_v7 }
 0x272   : > { %v3040_v35 = vadd.f32 %v5674_v40, %v3004_v38  ;;  %v3006_v37 = vmul.f32 %v5662_v61, %v2970_v63  ;;  %v2797_v33 = vrot.slane %v5975_v3, 2  ;;  %v4673_v24 = vpop.eup %4672  ;;  %v2616_v53 = vrot.slane %v5982_v14, 1 }
 0x273   : > { %v2793_v0 = vrot.slane %v5984_v47, 2  ;;  %v2625_v11 = vrot.slane %v6005_v54, 1  ;;  %v4675_v28 = vpop.eup %4674  ;;  %v3165_v41 = vadd.f32 1.0, %v4673_v24  ;;  %v2969_v60 = vmax.f32 %v2937_v59, 0.0  ;;  %v6347_v59 = vld [vmem:[#allocation4_spill] sm:$0xff] }
 0x274   : > { %v3711_v13 = vmul.f32 -1.442695, %v3040_v35  ;;  %v3042_v2 = vadd.f32 %v5674_v40, %v3006_v37  ;;  %v6148_v51 = vadd.f32 %v2792_v16, %v2686_v34  ;;  %v3260_v49 = vmul.f32 %v4675_v28, %v5978_v29  ;;  %v6345_v29 = vld [vmem:[#allocation3_spill] sm:$0xff]  ;;  %v6207_v28 = vld [vmem:[%s6305_s2 + $0x3] ss:$0 sm:$0xff] }
 0x275   : > { %v4677_v26 = vpop.eup %4676  ;;  %v2617_v3 = vsel %vm2556_vm1, %v2614_v21, %v2616_v53  ;;  %v2619_v14 = vsel %vm2556_vm1, %v2616_v53, %v2618_v39  ;;  %v3005_v58 = vmul.f32 %v5662_v61, %v2969_v60  ;;  %v2794_v39 = vsel %vm2733_vm2, %v2791_v4, %v2793_v0 }
 0x276   : > { %4684 = vpow2.f32 %v3711_v13  ;;  %v3167_v47 = vadd.f32 1.0, %v4677_v26  ;;  %v3713_v22 = vmul.f32 -1.442695, %v3042_v2  ;;  %3292 = vst [vmem:[%s5827_s7 + $0x90] sm:$0xff] %v3260_v49  ;;  %v2903_v25 = vmul.f32 %v6158_v19, %v6148_v51  ;;  %v6348_v13 = vld [vmem:[#allocation12_spill] sm:$0xff] }
 0x277   : > { %4686 = vrcp.f32 %v3165_v41  ;;  %v2687_v52 = vadd.f32 %v2617_v3, %v6345_v29  ;;  %v2688_v5 = vadd.f32 %v2619_v14, %v6346_v36  ;;  %v3041_v42 = vadd.f32 %v5674_v40, %v3005_v58  ;;  %v6350_v36 = vld [vmem:[#allocation6_spill] sm:$0xff] }
 0x278   : > { %4688 = vrcp.f32 %v3167_v47  ;;  %v2796_v61 = vsel %vm2733_vm2, %v2793_v0, %v2795_v8  ;;  %v2802_v44 = vrot.slane %v6007_v15, 2  ;;  %v2939_v10 = vadd.f32 %v6171_v20, %v2903_v25 }
 0x279   : > { %v4679_v30 = vpop.eup %4678  ;;  %4690 = vpow2.f32 %v3713_v22  ;;  %v6174_v46 = vadd.f32 %v2794_v39, %v2687_v52  ;;  %v3712_v6 = vmul.f32 -1.442695, %v3041_v42  ;;  %v6176_v38 = vadd.f32 %v2796_v61, %v2688_v5 }
 0x27a   : > { %v3166_v57 = vadd.f32 1.0, %v4679_v30  ;;  %v4681_v50 = vpop.eup %4680  ;;  %v2621_v40 = vrot.slane %v6012_v9, 1  ;;  %v2798_v8 = vrot.slane %v6014_v62, 2  ;;  %v2971_v63 = vmax.f32 %v2939_v10, 0.0  ;;  %v6191_v9 = vld [vmem:[%s6305_s2 + $0x2] ss:$0 sm:$0xff] }
 0x27b   : > { %v4683_v21 = vpop.eup %4682  ;;  %v3258_v4 = vmul.f32 %v4681_v50, %v6000_v12  ;;  %v2904_v27 = vmul.f32 %v6158_v19, %v6174_v46  ;;  %v2905_v43 = vmul.f32 %v6158_v19, %v6176_v38  ;;  %v2804_v24 = vrot.slane %v6024_v45, 2 }
 0x27c   : > { %4692 = vrcp.f32 %v3166_v57  ;;  %v3259_v35 = vmul.f32 %v4683_v21, %v6002_v17  ;;  %v2622_v16 = vsel %vm2556_vm1, %v2620_v31, %v2621_v40  ;;  %v3007_v12 = vmul.f32 %v6191_v9, %v2971_v63 }
 0x27d   : > { %4694 = vpow2.f32 %v3712_v6  ;;  %3290 = vst [vmem:[%s5827_s7 + $0x80] sm:$0xff] %v3258_v4  ;;  %v2940_v37 = vadd.f32 %v6171_v20, %v2904_v27  ;;  %v2689_v7 = vadd.f32 %v2622_v16, %v6347_v59  ;;  %v2799_v17 = vsel %vm2733_vm2, %v2797_v33, %v2798_v8  ;;  %v6349_v33 = vld [vmem:[#allocation13_spill] sm:$0xff]  ;;  %v6352_v27 = vld [vmem:[#allocation8_spill] sm:$0xff] }
 0x27e   : > { %3291 = vst [vmem:[%s5827_s7 + $0x88] sm:$0xff] %v3259_v35  ;;  %v2941_v34 = vadd.f32 %v6171_v20, %v2905_v43  ;;  %v2627_v31 = vrot.slane %v6022_v18, 1  ;;  %v2623_v53 = vrot.slane %v6348_v13, 1  ;;  %v3043_v41 = vadd.f32 %v6207_v28, %v3007_v12 }
 0x27f   : > { %v2972_v2 = vmax.f32 %v2940_v37, 0.0  ;;  %v6210_v60 = vadd.f32 %v2799_v17, %v2689_v7  ;;  %v2800_v26 = vrot.slane %v6349_v33, 2  ;;  %v2805_v14 = vsel %vm2733_vm2, %v2802_v44, %v2804_v24 }
 0x280   : > { %v4685_v0 = vpop.eup %4684  ;;  %v2973_v3 = vmax.f32 %v2941_v34, 0.0  ;;  %v2628_v45 = vsel %vm2556_vm1, %v2625_v11, %v2627_v31  ;;  %v3714_v22 = vmul.f32 -1.442695, %v3043_v41  ;;  %v2624_v39 = vsel %vm2556_vm1, %v2621_v40, %v2623_v53 }
 0x281   : > { %v4687_v49 = vpop.eup %4686  ;;  %v3168_v18 = vadd.f32 1.0, %v4685_v0  ;;  %v3008_v58 = vmul.f32 %v6191_v9, %v2972_v2  ;;  %v2906_v25 = vmul.f32 %v6158_v19, %v6210_v60  ;;  %v2692_v5 = vadd.f32 %v2628_v45, %v6350_v36 }
 0x282   : > { %v3261_v47 = vmul.f32 %v4687_v49, %v6052_v48  ;;  %v4689_v29 = vpop.eup %4688  ;;  %v3009_v52 = vmul.f32 %v6191_v9, %v2973_v3  ;;  %v2626_v6 = vsel %vm2556_vm1, %v2623_v53, %v2625_v11  ;;  %v2801_v59 = vsel %vm2733_vm2, %v2798_v8, %v2800_v26 }
 0x283   : > { %4696 = vrcp.f32 %v3168_v18  ;;  %v4691_v30 = vpop.eup %4690  ;;  %v3263_v42 = vmul.f32 %v4689_v29, %v6062_v23  ;;  %v3044_v48 = vadd.f32 %v6207_v28, %v3008_v58  ;;  %v2942_v61 = vadd.f32 %v6171_v20, %v2906_v25  ;;  %v6351_v23 = vld [vmem:[#allocation7_spill] sm:$0xff] }
 0x284   : > { %3293 = vst [vmem:[%s5827_s7 + $0x98] sm:$0xff] %v3261_v47  ;;  %4698 = vpow2.f32 %v3714_v22  ;;  %v3170_v57 = vadd.f32 1.0, %v4691_v30  ;;  %v3045_v10 = vadd.f32 %v6207_v28, %v3009_v52  ;;  %v6231_v50 = vadd.f32 %v2805_v14, %v2692_v5 }
 0x285   : > { %3295 = vst [vmem:[%s5827_s7 + $0xa8] sm:$0xff] %v3263_v42  ;;  %v3715_v21 = vmul.f32 -1.442695, %v3044_v48  ;;  %v2974_v4 = vmax.f32 %v2942_v61, 0.0  ;;  %v2690_v63 = vadd.f32 %v2624_v39, %v6351_v23  ;;  %v2691_v35 = vadd.f32 %v2626_v6, %v6352_v27 }
 0x286   : > { %v4693_v40 = vpop.eup %4692  ;;  %4700 = vrcp.f32 %v3170_v57  ;;  %v3716_v12 = vmul.f32 -1.442695, %v3045_v10  ;;  %v2909_v37 = vmul.f32 %v6158_v19, %v6231_v50 }
 0x287   : > { %v4695_v43 = vpop.eup %4694  ;;  %v3262_v16 = vmul.f32 %v4693_v40, %v6076_v32  ;;  %4702 = vpow2.f32 %v3715_v21  ;;  %v3010_v11 = vmul.f32 %v6191_v9, %v2974_v4  ;;  %v2803_v32 = vsel %vm2733_vm2, %v2800_v26, %v2802_v44 }
 0x288   : > { %v3169_v54 = vadd.f32 1.0, %v4695_v43  ;;  %4704 = vpow2.f32 %v3716_v12  ;;  %v2945_v7 = vadd.f32 %v6171_v20, %v2909_v37  ;;  %v6251_v17 = vadd.f32 %v2801_v59, %v2690_v63 }
 0x289   : > { %3294 = vst [vmem:[%s5827_s7 + $0xa0] sm:$0xff] %v3262_v16  ;;  %v3046_v34 = vadd.f32 %v6207_v28, %v3010_v11  ;;  %v6254_v31 = vadd.f32 %v2803_v32, %v2691_v35 }
 0x28a   : > { %4706 = vrcp.f32 %v3169_v54  ;;  %v2977_v24 = vmax.f32 %v2945_v7, 0.0  ;;  %v2907_v62 = vmul.f32 %v6158_v19, %v6251_v17 }
 0x28b   : > { %v3717_v8 = vmul.f32 -1.442695, %v3046_v34  ;;  %v2908_v13 = vmul.f32 %v6158_v19, %v6254_v31 }
 0x28c   : > { %v3013_v15 = vmul.f32 %v6191_v9, %v2977_v24  ;;  %v2943_v44 = vadd.f32 %v6171_v20, %v2907_v62 }
 0x28d   : > { %v4697_v53 = vpop.eup %4696  ;;  %4708 = vpow2.f32 %v3717_v8  ;;  %v2944_v2 = vadd.f32 %v6171_v20, %v2908_v13 }
 0x28e   : > { %v4699_v0 = vpop.eup %4698  ;;  %v3264_v41 = vmul.f32 %v4697_v53, %v6102_v55  ;;  %v3049_v26 = vadd.f32 %v6207_v28, %v3013_v15  ;;  %v2975_v49 = vmax.f32 %v2943_v44, 0.0 }
 0x28f   : > { %v3171_v33 = vadd.f32 1.0, %v4699_v0  ;;  %v2976_v18 = vmax.f32 %v2944_v2, 0.0 }
 0x290   : > { %3296 = vst [vmem:[%s5827_s7 + $0xb0] sm:$0xff] %v3264_v41  ;;  %v4701_v3 = vpop.eup %4700  ;;  %v3720_v19 = vmul.f32 -1.442695, %v3049_v26  ;;  %v3011_v45 = vmul.f32 %v6191_v9, %v2975_v49 }
 0x291   : > { %4710 = vrcp.f32 %v3171_v33  ;;  %v4703_v14 = vpop.eup %4702  ;;  %v3266_v47 = vmul.f32 %v4701_v3, %v6112_v56  ;;  %v3012_v55 = vmul.f32 %v6191_v9, %v2976_v18 }
 0x292   : > { %v4705_v22 = vpop.eup %4704  ;;  %v3172_v20 = vadd.f32 1.0, %v4703_v14  ;;  %4712 = vpow2.f32 %v3720_v19  ;;  %v3047_v58 = vadd.f32 %v6207_v28, %v3011_v45 }
 0x293   : > { %3298 = vst [vmem:[%s5827_s7 + $0xc0] sm:$0xff] %v3266_v47  ;;  %v3173_v29 = vadd.f32 1.0, %v4705_v22  ;;  %v3048_v52 = vadd.f32 %v6207_v28, %v3012_v55 }
 0x294   : > { %v4707_v25 = vpop.eup %4706  ;;  %4714 = vrcp.f32 %v3172_v20  ;;  %v3718_v5 = vmul.f32 -1.442695, %v3047_v58 }
 0x295   : > { %v3265_v36 = vmul.f32 %v4707_v25, %v6128_v1  ;;  %4716 = vrcp.f32 %v3173_v29  ;;  %v3719_v39 = vmul.f32 -1.442695, %v3048_v52 }
 0x296   : > { %4718 = vpow2.f32 %v3718_v5 }
 0x297   : > { %3297 = vst [vmem:[%s5827_s7 + $0xb8] sm:$0xff] %v3265_v36  ;;  %v4709_v56 = vpop.eup %4708  ;;  %4720 = vpow2.f32 %v3719_v39 }
 0x298   : > { %v3174_v9 = vadd.f32 1.0, %v4709_v56 }
 0x29a   : > { %4722 = vrcp.f32 %v3174_v9 }
 0x29b   : > { %v4711_v30 = vpop.eup %4710 }
 0x29c   : > { %v3267_v42 = vmul.f32 %v4711_v30, %v6148_v51  ;;  %v4713_v48 = vpop.eup %4712 }
 0x29d   : > { %v3177_v28 = vadd.f32 1.0, %v4713_v48 }
 0x29e   : > { %3299 = vst [vmem:[%s5827_s7 + $0xc8] sm:$0xff] %v3267_v42  ;;  %v4715_v1 = vpop.eup %4714 }
 0x29f   : > { %v4717_v61 = vpop.eup %4716  ;;  %v3268_v57 = vmul.f32 %v4715_v1, %v6174_v46  ;;  %4724 = vrcp.f32 %v3177_v28 }
 0x2a0   : > { %v4719_v10 = vpop.eup %4718  ;;  %v3269_v6 = vmul.f32 %v4717_v61, %v6176_v38 }
 0x2a1   : > { %v4721_v40 = vpop.eup %4720  ;;  %3300 = vst [vmem:[%s5827_s7 + $0xd0] sm:$0xff] %v3268_v57  ;;  %v3175_v21 = vadd.f32 1.0, %v4719_v10 }
 0x2a2   : > { %3301 = vst [vmem:[%s5827_s7 + $0xd8] sm:$0xff] %v3269_v6  ;;  %v3176_v51 = vadd.f32 1.0, %v4721_v40 }
 0x2a3   : > { %4726 = vrcp.f32 %v3175_v21 }
 0x2a4   : > { %v4723_v4 = vpop.eup %4722  ;;  %4728 = vrcp.f32 %v3176_v51 }
 0x2a5   : > { %v3270_v23 = vmul.f32 %v4723_v4, %v6210_v60 }
 0x2a7   : > { %3302 = vst [vmem:[%s5827_s7 + $0xe0] sm:$0xff] %v3270_v23 }
 0x2a9   : > { %v4725_v63 = vpop.eup %4724 }
 0x2aa   : > { %v3273_v46 = vmul.f32 %v4725_v63, %v6231_v50 }
 0x2ac   : > { %3305 = vst [vmem:[%s5827_s7 + $0xf8] sm:$0xff] %v3273_v46 }
 0x2ad   : > { %v4727_v27 = vpop.eup %4726 }
 0x2ae   : > { %v4729_v35 = vpop.eup %4728  ;;  %v3271_v38 = vmul.f32 %v4727_v27, %v6251_v17 }
 0x2af   : > { %v3272_v43 = vmul.f32 %v4729_v35, %v6254_v31 }
 0x2b0   : > { %3303 = vst [vmem:[%s5827_s7 + $0xe8] sm:$0xff] %v3271_v38 }
 0x2b1   : > { %3304 = vst [vmem:[%s5827_s7 + $0xf0] sm:$0xff] %v3272_v43 }
 0x2b2 PF: > { %s13_s16 = sadd.s32 1, %s4772_s16   ;;  %s6353_s12 = smov %s4764_s14 }
 0x2b3   : > { %p10_p7 = scmp.ge.s32.totalorder %s13_s16, 10   ;;  %s6354_s13 = smov %s4768_s15 }
 0x2b4   : > { %s6355_s14 = smov %s6358_s17  ;;  %s6356_s15 = smov %s6362_s18 }
 0x2b5   :  { %12 = sbr.rel (!%p10_p7) target bundleno = 3 (0x3), region = 70 }

</bundles_post_ra>
